<compile_context>
chip_gen: v7x
topology: tpu7x:2x2x1
jax: 0.10.0
libtpu: 0.0.40
codegen_flags: <defaults>
</compile_context>

<pallas_src>
import jax
import jax.numpy as jnp
import numpy as np
from jax.experimental import pallas as pl
from jax.experimental.pallas import tpu as pltpu


# Tap ordering: inner 3x3 window first (shared by both convs), then the outer
# ring of the 5x5 window.
_INNER = [(dy, dx) for dy in (-1, 0, 1) for dx in (-1, 0, 1)]
_OUTER = [(dy, dx) for dy in range(-2, 3) for dx in range(-2, 3)
          if not (abs(dy) <= 1 and abs(dx) <= 1)]
_TAPS = _INNER + _OUTER                      # 9 + 16 = 25


def _build_tap_masks(H, W):
    """(25, H*W) float32 validity masks implementing 'same' zero padding."""
    HW = H * W
    yy, xx = np.meshgrid(np.arange(H), np.arange(W), indexing='ij')
    masks = np.ones((len(_TAPS), HW), np.float32)
    for k, (dy, dx) in enumerate(_TAPS):
        valid = ((yy + dy >= 0) & (yy + dy < H)
                 & (xx + dx >= 0) & (xx + dx < W))
        masks[k] = valid.reshape(HW).astype(np.float32)
    return jnp.asarray(masks)


# ----------------------------------------------------------------------------
# Fused GBF Pallas kernel (per image): GloRe(r), GloRe(d), s = con1(r+d)-con(r+d)
# ----------------------------------------------------------------------------
def _make_gbf_kernel(C, H, W):
    HW = H * W
    inv_hw = 1.0 / float(HW)

    def kernel(r_ref, d_ref, mask_ref,
               wsp_ref, bsp_ref, w1t_ref, b1_ref, w2_ref, we_ref,
               gs_ref, gb_ref,
               w3_ref, s3_ref, b3_ref, w5_ref, s5_ref, b5_ref,
               r_out_ref, s_out_ref, d_out_ref,
               taps_ref):
        wsp, bsp = wsp_ref[...], bsp_ref[...]          # (3C, C), (3C, 1)
        w1t, b1 = w1t_ref[...], b1_ref[...]            # (C, C),  (1, C)
        w2, we = w2_ref[...], we_ref[...]              # (2C,2C), (C, 2C)
        g_scale, g_bias = gs_ref[...], gb_ref[...]     # (C, 1)

        def glore(x):                                  # x: (C, HW) f32
            # fused conv_state / conv_proj (both 1x1 on the same input)
            y = jnp.dot(wsp, x, preferred_element_type=jnp.float32) + bsp   # (3C, HW)
            xs = y[:2 * C, :]                          # (2C, HW)  state
            xp = y[2 * C:, :]                          # (C,  HW)  proj
            # coordinate -> interaction space, normalised by H*W (normalize=True)
            xn = jax.lax.dot_general(
                xs, xp, (((1,), (1,)), ((), ())),
                preferred_element_type=jnp.float32) * inv_hw                # (2C, C)
            # GCN: node mixing (+bias), residual, ReLU, state mixing
            h = jnp.dot(xn, w1t, preferred_element_type=jnp.float32) + b1   # (2C, C)
            h = jnp.maximum(h + xn, 0.0)
            xrel = jnp.dot(w2, h, preferred_element_type=jnp.float32)       # (2C, C)
            # interaction -> coordinate space, 1x1 extend, folded BN, residual
            xst = jnp.dot(xrel, xp, preferred_element_type=jnp.float32)     # (2C, HW)
            ext = jnp.dot(we, xst, preferred_element_type=jnp.float32)      # (C,  HW)
            return x + ext * g_scale + g_bias

        r = glore(r_ref[0].astype(jnp.float32))
        d = glore(d_ref[0].astype(jnp.float32))
        s_in = r + d

        # Build all 25 shifted + zero-padded taps of s_in into VMEM scratch
        # (inner 3x3 window first).  Each tap = lane rotate (XLU) + precomputed
        # boundary mask — implicit 'same' zero padding, no jnp.pad copies.
        for k, (dy, dx) in enumerate(_TAPS):
            shift = (-(dy * W + dx)) % HW              # static python int
            tap = pltpu.roll(s_in, shift, 1) if shift else s_in
            if (dy, dx) != (0, 0):
                tap = tap * mask_ref[pl.ds(k, 1), :]
            taps_ref[pl.ds(k * C, C), :] = tap

        taps = taps_ref[...]                           # (25C, HW)
        acc5 = jnp.dot(w5_ref[...], taps,
                       preferred_element_type=jnp.float32)            # (C, HW)
        acc3 = jnp.dot(w3_ref[...], taps[:9 * C, :],
                       preferred_element_type=jnp.float32)            # (C, HW)

        t5 = jnp.maximum(acc5 * s5_ref[...] + b5_ref[...], 0.0)   # BasicConv2d 5x5
        t3 = jnp.maximum(acc3 * s3_ref[...] + b3_ref[...], 0.0)   # BasicConv2d 3x3
        s = t5 - t3

        r_out_ref[0] = (s + r).astype(r_out_ref.dtype)
        s_out_ref[0] = s.astype(s_out_ref.dtype)
        d_out_ref[0] = d.astype(d_out_ref.dtype)       # GloRe(d); filtered outside

    return kernel


# ----------------------------------------------------------------------------
# Frequency filter (FFT) — no Pallas equivalent, stays in plain JAX
# ----------------------------------------------------------------------------
def apply_frequency_filter(x, cutoff_ratio=0.25):
    # TODO(synk): exact apply_frequency_filter source not in the prompt; a
    # canonical ideal low-pass FFT filter is used.  FFT has no Pallas primitive
    # so it runs as an XLA FFT on both the kernel path and the reference.
    H, W = x.shape[-2], x.shape[-1]
    f = jnp.fft.fftshift(jnp.fft.fft2(x, axes=(-2, -1)), axes=(-2, -1))
    yy = jnp.abs(jnp.arange(H) - H // 2)
    xx = jnp.abs(jnp.arange(W) - W // 2)
    ry = max(int(H * cutoff_ratio), 1)
    rx = max(int(W * cutoff_ratio), 1)
    mask = ((yy[:, None] <= ry) & (xx[None, :] <= rx)).astype(jnp.float32)
    f = f * mask
    out = jnp.fft.ifft2(jnp.fft.ifftshift(f, axes=(-2, -1)), axes=(-2, -1))
    return jnp.real(out).astype(x.dtype)


# ----------------------------------------------------------------------------
# GBF forward (single fused pallas_call + FFT filter glue)
# ----------------------------------------------------------------------------
def gbf_forward(r, d, P):
    N, C, H, W = r.shape
    HW = H * W
    G = P['glore']

    masks = _build_tap_masks(H, W)                                   # (25, HW)

    # Fuse conv_state + conv_proj weights (both 1x1 over the same input).
    wsp = jnp.concatenate([G['ws'], G['wp']], axis=0)                # (3C, C)
    bsp = jnp.concatenate([G['bs'], G['bp']], axis=0).reshape(3 * C, 1)

    # Reorder conv weights to match the stacked-tap layout (inner 3x3 first).
    w5all = jnp.concatenate(
        [P['w5'][:, :, dy + 2, dx + 2] for (dy, dx) in _TAPS], axis=1)       # (C, 25C)
    w3all = jnp.concatenate(
        [P['w3'][:, :, dy + 1, dx + 1] for (dy, dx) in _TAPS[:9]], axis=1)   # (C, 9C)

    const_args = [
        masks,
        wsp, bsp,
        G['w1'].T, G['b1'].reshape(1, C),
        G['w2'], G['we'],
        G['g_scale'].reshape(C, 1), G['g_bias'].reshape(C, 1),
        w3all, P['bn3_s'].reshape(C, 1), P['bn3_b'].reshape(C, 1),
        w5all, P['bn5_s'].reshape(C, 1), P['bn5_b'].reshape(C, 1),
    ]

    img_spec = pl.BlockSpec((1, C, HW), lambda b: (b, 0, 0))

    def const_spec(a):
        idx = (0,) * a.ndim
        return pl.BlockSpec(a.shape, lambda b, _idx=idx: _idx)

    r_out, s_out, d_gl = pl.pallas_call(
        _make_gbf_kernel(C, H, W),
        out_shape=(jax.ShapeDtypeStruct((N, C, HW), jnp.float32),) * 3,
        grid_spec=pltpu.PrefetchScalarGridSpec(
            num_scalar_prefetch=0,
            grid=(N,),
            in_specs=[img_spec, img_spec] + [const_spec(a) for a in const_args],
            out_specs=(img_spec,) * 3,
            scratch_shapes=[pltpu.VMEM((len(_TAPS) * C, HW), jnp.float32)]),
        compiler_params=pltpu.CompilerParams(dimension_semantics=("parallel",)),
    )(r.reshape(N, C, HW), d.reshape(N, C, HW), *const_args)

    d_f = apply_frequency_filter(d_gl.reshape(N, C, H, W))
    r_final = r_out.reshape(N, C, H, W)
    d_final = s_out.reshape(N, C, H, W) + d_f
    return r_final, d_final


# ----------------------------------------------------------------------------
# Pure-JAX reference (for correctness check), NCHW like PyTorch
# ----------------------------------------------------------------------------
def ref_glore(x, G):
    N, C, H, W = x.shape
    HW = H * W
    num_s = G['ws'].shape[0]
    xs = (jnp.einsum('oc,nchw->nohw', G['ws'], x, precision='highest')
          + G['bs'].reshape(1, num_s, 1, 1)).reshape(N, num_s, HW)
    xp = (jnp.einsum('oc,nchw->nohw', G['wp'], x, precision='highest')
          + G['bp'].reshape(1, C, 1, 1)).reshape(N, C, HW)
    xn = jnp.matmul(xs, jnp.transpose(xp, (0, 2, 1)),
                    precision='highest') * (1.0 / HW)                 # (N, 2C, C)
    h = (jnp.einsum('ji,nsi->nsj', G['w1'], xn, precision='highest')
         + G['b1'].reshape(1, 1, C))
    h = jnp.maximum(h + xn, 0.0)
    xrel = jnp.einsum('ts,nsj->ntj', G['w2'], h, precision='highest')
    xst = jnp.matmul(xrel, xp, precision='highest')                   # (N, 2C, HW)
    ext = jnp.einsum('os,nsh->noh', G['we'], xst,
                     precision='highest').reshape(N, C, H, W)
    return x + ext * G['g_scale'].reshape(1, C, 1, 1) + G['g_bias'].reshape(1, C, 1, 1)


def ref_basic_conv(x, w, scale, bias, pad):
    out = jax.lax.conv_general_dilated(
        x, w, (1, 1), ((pad, pad), (pad, pad)),
        dimension_numbers=('NCHW', 'OIHW', 'NCHW'),
        precision=jax.lax.Precision.HIGHEST)
    return jnp.maximum(out * scale.reshape(1, -1, 1, 1)
                       + bias.reshape(1, -1, 1, 1), 0.0)


def ref_gbf(r, d, P):
    G = P['glore']
    r1 = ref_glore(r, G)
    d1 = ref_glore(d, G)
    s = r1 + d1
    s = (ref_basic_conv(s, P['w5'], P['bn5_s'], P['bn5_b'], 2)
         - ref_basic_conv(s, P['w3'], P['bn3_s'], P['bn3_b'], 1))
    df = apply_frequency_filter(d1)
    return s + r1, s + df


# ----------------------------------------------------------------------------
# Deterministic synthetic parameters (eval-mode BN folded to scale/bias)
# ----------------------------------------------------------------------------
def _fold_bn(key, C, eps):
    k1, k2, k3, k4 = jax.random.split(key, 4)
    gamma = jax.random.uniform(k1, (C,), minval=0.5, maxval=1.5)
    beta = 0.1 * jax.random.normal(k2, (C,))
    mean = 0.1 * jax.random.normal(k3, (C,))
    var = jax.random.uniform(k4, (C,), minval=0.5, maxval=1.5)
    scale = gamma / jnp.sqrt(var + eps)
    bias = beta - mean * scale
    return scale.astype(jnp.float32), bias.astype(jnp.float32)


def init_params(key, C):
    ks = jax.random.split(key, 16)
    g = 0.1
    g_scale, g_bias = _fold_bn(ks[8], C, 1e-4)          # GloRe blocker BN (eps=1e-4)
    glore = {
        'ws': g * jax.random.normal(ks[0], (2 * C, C), jnp.float32),   # conv_state
        'bs': 0.1 * jax.random.normal(ks[1], (2 * C,), jnp.float32),
        'wp': g * jax.random.normal(ks[2], (C, C), jnp.float32),       # conv_proj
        'bp': 0.1 * jax.random.normal(ks[3], (C,), jnp.float32),
        'w1': g * jax.random.normal(ks[4], (C, C), jnp.float32),       # gcn.conv1
        'b1': 0.1 * jax.random.normal(ks[5], (C,), jnp.float32),
        'w2': g * jax.random.normal(ks[6], (2 * C, 2 * C), jnp.float32),  # gcn.conv2
        'we': g * jax.random.normal(ks[7], (C, 2 * C), jnp.float32),   # conv_extend
        'g_scale': g_scale, 'g_bias': g_bias,
    }
    bn3_s, bn3_b = _fold_bn(ks[10], C, 1e-5)
    bn5_s, bn5_b = _fold_bn(ks[12], C, 1e-5)
    return {
        'glore': glore,
        'w3': g * jax.random.normal(ks[9], (C, C, 3, 3), jnp.float32),   # con (3x3)
        'bn3_s': bn3_s, 'bn3_b': bn3_b,
        'w5': g * jax.random.normal(ks[11], (C, C, 5, 5), jnp.float32),  # con1 (5x5)
        'bn5_s': bn5_s, 'bn5_b': bn5_b,
    }


if __name__ == "__main__":
    N, C, H, W = 2, 8, 16, 16                       # NCHW, like the PyTorch module
    key = jax.random.PRNGKey(0)
    kr, kd, kp = jax.random.split(key, 3)
    r = jax.random.normal(kr, (N, C, H, W), jnp.float32)
    d = jax.random.normal(kd, (N, C, H, W), jnp.float32)
    P = init_params(kp, C)

    r_out, d_out = gbf_forward(r, d, P)
    jax.block_until_ready((r_out, d_out))

    r_ref, d_ref = ref_gbf(r, d, P)
    assert r_out.shape == (N, C, H, W) and d_out.shape == (N, C, H, W)
    err = max(float(jnp.max(jnp.abs(r_out - r_ref))),
              float(jnp.max(jnp.abs(d_out - d_ref))))
    assert err < 2e-2, f"max abs err {err}"
    print("KERNEL_OK")
</pallas_src>

<mosaic_0001>
module attributes {stable_mosaic.version = 11 : i64} {
  func.func @kernel(%arg0: i32, %arg1: memref<1x8x256xf32, #tpu.memory_space<vmem>>, %arg2: memref<1x8x256xf32, #tpu.memory_space<vmem>>, %arg3: memref<25x256xf32, #tpu.memory_space<vmem>>, %arg4: memref<24x8xf32, #tpu.memory_space<vmem>>, %arg5: memref<24x1xf32, #tpu.memory_space<vmem>>, %arg6: memref<8x8xf32, #tpu.memory_space<vmem>>, %arg7: memref<1x8xf32, #tpu.memory_space<vmem>>, %arg8: memref<16x16xf32, #tpu.memory_space<vmem>>, %arg9: memref<8x16xf32, #tpu.memory_space<vmem>>, %arg10: memref<8x1xf32, #tpu.memory_space<vmem>>, %arg11: memref<8x1xf32, #tpu.memory_space<vmem>>, %arg12: memref<8x72xf32, #tpu.memory_space<vmem>>, %arg13: memref<8x1xf32, #tpu.memory_space<vmem>>, %arg14: memref<8x1xf32, #tpu.memory_space<vmem>>, %arg15: memref<8x200xf32, #tpu.memory_space<vmem>>, %arg16: memref<8x1xf32, #tpu.memory_space<vmem>>, %arg17: memref<8x1xf32, #tpu.memory_space<vmem>>, %arg18: memref<1x8x256xf32, #tpu.memory_space<vmem>>, %arg19: memref<1x8x256xf32, #tpu.memory_space<vmem>>, %arg20: memref<1x8x256xf32, #tpu.memory_space<vmem>>, %arg21: memref<200x256xf32, #tpu.memory_space<vmem>>) attributes {dimension_semantics = [#tpu.dimension_semantics<parallel>], iteration_bounds = array<i64: 2>, scalar_prefetch = 0 : i64, scratch_operands = 1 : i64, tpu.core_type = #tpu.core_type<tc>, window_params = [{transform_indices = @transform_0, window_bounds = array<i64: 1, 8, 256>}, {transform_indices = @transform_1, window_bounds = array<i64: 1, 8, 256>}, {pipeline_mode = #tpu.pipeline_mode<synchronous>, transform_indices = @transform_2, window_bounds = array<i64: 25, 256>}, {pipeline_mode = #tpu.pipeline_mode<synchronous>, transform_indices = @transform_3, window_bounds = array<i64: 24, 8>}, {pipeline_mode = #tpu.pipeline_mode<synchronous>, transform_indices = @transform_4, window_bounds = array<i64: 24, 1>}, {pipeline_mode = #tpu.pipeline_mode<synchronous>, transform_indices = @transform_5, window_bounds = array<i64: 8, 8>}, {pipeline_mode = #tpu.pipeline_mode<synchronous>, transform_indices = @transform_6, window_bounds = array<i64: 1, 8>}, {pipeline_mode = #tpu.pipeline_mode<synchronous>, transform_indices = @transform_7, window_bounds = array<i64: 16, 16>}, {pipeline_mode = #tpu.pipeline_mode<synchronous>, transform_indices = @transform_8, window_bounds = array<i64: 8, 16>}, {pipeline_mode = #tpu.pipeline_mode<synchronous>, transform_indices = @transform_9, window_bounds = array<i64: 8, 1>}, {pipeline_mode = #tpu.pipeline_mode<synchronous>, transform_indices = @transform_10, window_bounds = array<i64: 8, 1>}, {pipeline_mode = #tpu.pipeline_mode<synchronous>, transform_indices = @transform_11, window_bounds = array<i64: 8, 72>}, {pipeline_mode = #tpu.pipeline_mode<synchronous>, transform_indices = @transform_12, window_bounds = array<i64: 8, 1>}, {pipeline_mode = #tpu.pipeline_mode<synchronous>, transform_indices = @transform_13, window_bounds = array<i64: 8, 1>}, {pipeline_mode = #tpu.pipeline_mode<synchronous>, transform_indices = @transform_14, window_bounds = array<i64: 8, 200>}, {pipeline_mode = #tpu.pipeline_mode<synchronous>, transform_indices = @transform_15, window_bounds = array<i64: 8, 1>}, {pipeline_mode = #tpu.pipeline_mode<synchronous>, transform_indices = @transform_16, window_bounds = array<i64: 8, 1>}, {transform_indices = @transform_17, window_bounds = array<i64: 1, 8, 256>}, {transform_indices = @transform_18, window_bounds = array<i64: 1, 8, 256>}, {transform_indices = @transform_19, window_bounds = array<i64: 1, 8, 256>}]} {
    %c0 = arith.constant 0 : index
    %c0_0 = arith.constant 0 : index
    %0 = vector.load %arg4[%c0, %c0_0] : memref<24x8xf32, #tpu.memory_space<vmem>>, vector<24x8xf32>
    %c0_1 = arith.constant 0 : index
    %c0_2 = arith.constant 0 : index
    %1 = vector.load %arg5[%c0_1, %c0_2] : memref<24x1xf32, #tpu.memory_space<vmem>>, vector<24x1xf32>
    %c0_3 = arith.constant 0 : index
    %c0_4 = arith.constant 0 : index
    %2 = vector.load %arg6[%c0_3, %c0_4] : memref<8x8xf32, #tpu.memory_space<vmem>>, vector<8x8xf32>
    %c0_5 = arith.constant 0 : index
    %c0_6 = arith.constant 0 : index
    %3 = vector.load %arg7[%c0_5, %c0_6] : memref<1x8xf32, #tpu.memory_space<vmem>>, vector<1x8xf32>
    %c0_7 = arith.constant 0 : index
    %c0_8 = arith.constant 0 : index
    %4 = vector.load %arg8[%c0_7, %c0_8] : memref<16x16xf32, #tpu.memory_space<vmem>>, vector<16x16xf32>
    %c0_9 = arith.constant 0 : index
    %c0_10 = arith.constant 0 : index
    %5 = vector.load %arg9[%c0_9, %c0_10] : memref<8x16xf32, #tpu.memory_space<vmem>>, vector<8x16xf32>
    %c0_11 = arith.constant 0 : index
    %c0_12 = arith.constant 0 : index
    %6 = vector.load %arg10[%c0_11, %c0_12] : memref<8x1xf32, #tpu.memory_space<vmem>>, vector<8x1xf32>
    %c0_13 = arith.constant 0 : index
    %c0_14 = arith.constant 0 : index
    %7 = vector.load %arg11[%c0_13, %c0_14] : memref<8x1xf32, #tpu.memory_space<vmem>>, vector<8x1xf32>
    %c0_15 = arith.constant 0 : index
    %c0_16 = arith.constant 0 : index
    %c0_17 = arith.constant 0 : index
    %8 = vector.load %arg1[%c0_15, %c0_16, %c0_17] : memref<1x8x256xf32, #tpu.memory_space<vmem>>, vector<1x8x256xf32>
    %9 = vector.shape_cast %8 : vector<1x8x256xf32> to vector<8x256xf32>
    %cst = arith.constant dense<0.000000e+00> : vector<24x256xf32>
    %10 = tpu.matmul %0, %9, %cst {dimension_numbers = #tpu.dot_dimension_numbers<[1], [0], [0], [1], [0, 0, 1, 1], [], []>} : vector<24x8xf32>, vector<8x256xf32>, vector<24x256xf32> -> vector<24x256xf32>
    %11 = vector.broadcast %1 : vector<24x1xf32> to vector<24x256xf32>
    %12 = arith.addf %10, %11 : vector<24x256xf32>
    %13 = vector.extract_strided_slice %12 {offsets = [0, 0], sizes = [16, 256], strides = [1, 1]} : vector<24x256xf32> to vector<16x256xf32>
    %14 = vector.extract_strided_slice %12 {offsets = [16, 0], sizes = [8, 256], strides = [1, 1]} : vector<24x256xf32> to vector<8x256xf32>
    %cst_18 = arith.constant dense<0.000000e+00> : vector<16x8xf32>
    %15 = tpu.matmul %13, %14, %cst_18 {dimension_numbers = #tpu.dot_dimension_numbers<[1], [1], [0], [0], [0, 0, 1, 0], [], []>} : vector<16x256xf32>, vector<8x256xf32>, vector<16x8xf32> -> vector<16x8xf32>
    %cst_19 = arith.constant 3.906250e-03 : f32
    %16 = vector.broadcast %cst_19 : f32 to vector<16x8xf32>
    %17 = arith.mulf %15, %16 : vector<16x8xf32>
    %cst_20 = arith.constant dense<0.000000e+00> : vector<16x8xf32>
    %18 = tpu.matmul %17, %2, %cst_20 {dimension_numbers = #tpu.dot_dimension_numbers<[1], [0], [0], [1], [0, 0, 1, 1], [], []>} : vector<16x8xf32>, vector<8x8xf32>, vector<16x8xf32> -> vector<16x8xf32>
    %19 = vector.broadcast %3 : vector<1x8xf32> to vector<16x8xf32>
    %20 = arith.addf %18, %19 : vector<16x8xf32>
    %21 = arith.addf %20, %17 : vector<16x8xf32>
    %cst_21 = arith.constant 0.000000e+00 : f32
    %22 = vector.broadcast %cst_21 : f32 to vector<16x8xf32>
    %23 = arith.maximumf %21, %22 : vector<16x8xf32>
    %cst_22 = arith.constant dense<0.000000e+00> : vector<16x8xf32>
    %24 = tpu.matmul %4, %23, %cst_22 {dimension_numbers = #tpu.dot_dimension_numbers<[1], [0], [0], [1], [0, 0, 1, 1], [], []>} : vector<16x16xf32>, vector<16x8xf32>, vector<16x8xf32> -> vector<16x8xf32>
    %cst_23 = arith.constant dense<0.000000e+00> : vector<16x256xf32>
    %25 = tpu.matmul %24, %14, %cst_23 {dimension_numbers = #tpu.dot_dimension_numbers<[1], [0], [0], [1], [0, 0, 1, 1], [], []>} : vector<16x8xf32>, vector<8x256xf32>, vector<16x256xf32> -> vector<16x256xf32>
    %cst_24 = arith.constant dense<0.000000e+00> : vector<8x256xf32>
    %26 = tpu.matmul %5, %25, %cst_24 {dimension_numbers = #tpu.dot_dimension_numbers<[1], [0], [0], [1], [0, 0, 1, 1], [], []>} : vector<8x16xf32>, vector<16x256xf32>, vector<8x256xf32> -> vector<8x256xf32>
    %27 = vector.broadcast %6 : vector<8x1xf32> to vector<8x256xf32>
    %28 = arith.mulf %26, %27 : vector<8x256xf32>
    %29 = arith.addf %9, %28 : vector<8x256xf32>
    %30 = vector.broadcast %7 : vector<8x1xf32> to vector<8x256xf32>
    %31 = arith.addf %29, %30 : vector<8x256xf32>
    %c0_25 = arith.constant 0 : index
    %c0_26 = arith.constant 0 : index
    %c0_27 = arith.constant 0 : index
    %32 = vector.load %arg2[%c0_25, %c0_26, %c0_27] : memref<1x8x256xf32, #tpu.memory_space<vmem>>, vector<1x8x256xf32>
    %33 = vector.shape_cast %32 : vector<1x8x256xf32> to vector<8x256xf32>
    %cst_28 = arith.constant dense<0.000000e+00> : vector<24x256xf32>
    %34 = tpu.matmul %0, %33, %cst_28 {dimension_numbers = #tpu.dot_dimension_numbers<[1], [0], [0], [1], [0, 0, 1, 1], [], []>} : vector<24x8xf32>, vector<8x256xf32>, vector<24x256xf32> -> vector<24x256xf32>
    %35 = vector.broadcast %1 : vector<24x1xf32> to vector<24x256xf32>
    %36 = arith.addf %34, %35 : vector<24x256xf32>
    %37 = vector.extract_strided_slice %36 {offsets = [0, 0], sizes = [16, 256], strides = [1, 1]} : vector<24x256xf32> to vector<16x256xf32>
    %38 = vector.extract_strided_slice %36 {offsets = [16, 0], sizes = [8, 256], strides = [1, 1]} : vector<24x256xf32> to vector<8x256xf32>
    %cst_29 = arith.constant dense<0.000000e+00> : vector<16x8xf32>
    %39 = tpu.matmul %37, %38, %cst_29 {dimension_numbers = #tpu.dot_dimension_numbers<[1], [1], [0], [0], [0, 0, 1, 0], [], []>} : vector<16x256xf32>, vector<8x256xf32>, vector<16x8xf32> -> vector<16x8xf32>
    %cst_30 = arith.constant 3.906250e-03 : f32
    %40 = vector.broadcast %cst_30 : f32 to vector<16x8xf32>
    %41 = arith.mulf %39, %40 : vector<16x8xf32>
    %cst_31 = arith.constant dense<0.000000e+00> : vector<16x8xf32>
    %42 = tpu.matmul %41, %2, %cst_31 {dimension_numbers = #tpu.dot_dimension_numbers<[1], [0], [0], [1], [0, 0, 1, 1], [], []>} : vector<16x8xf32>, vector<8x8xf32>, vector<16x8xf32> -> vector<16x8xf32>
    %43 = vector.broadcast %3 : vector<1x8xf32> to vector<16x8xf32>
    %44 = arith.addf %42, %43 : vector<16x8xf32>
    %45 = arith.addf %44, %41 : vector<16x8xf32>
    %cst_32 = arith.constant 0.000000e+00 : f32
    %46 = vector.broadcast %cst_32 : f32 to vector<16x8xf32>
    %47 = arith.maximumf %45, %46 : vector<16x8xf32>
    %cst_33 = arith.constant dense<0.000000e+00> : vector<16x8xf32>
    %48 = tpu.matmul %4, %47, %cst_33 {dimension_numbers = #tpu.dot_dimension_numbers<[1], [0], [0], [1], [0, 0, 1, 1], [], []>} : vector<16x16xf32>, vector<16x8xf32>, vector<16x8xf32> -> vector<16x8xf32>
    %cst_34 = arith.constant dense<0.000000e+00> : vector<16x256xf32>
    %49 = tpu.matmul %48, %38, %cst_34 {dimension_numbers = #tpu.dot_dimension_numbers<[1], [0], [0], [1], [0, 0, 1, 1], [], []>} : vector<16x8xf32>, vector<8x256xf32>, vector<16x256xf32> -> vector<16x256xf32>
    %cst_35 = arith.constant dense<0.000000e+00> : vector<8x256xf32>
    %50 = tpu.matmul %5, %49, %cst_35 {dimension_numbers = #tpu.dot_dimension_numbers<[1], [0], [0], [1], [0, 0, 1, 1], [], []>} : vector<8x16xf32>, vector<16x256xf32>, vector<8x256xf32> -> vector<8x256xf32>
    %51 = vector.broadcast %6 : vector<8x1xf32> to vector<8x256xf32>
    %52 = arith.mulf %50, %51 : vector<8x256xf32>
    %53 = arith.addf %33, %52 : vector<8x256xf32>
    %54 = vector.broadcast %7 : vector<8x1xf32> to vector<8x256xf32>
    %55 = arith.addf %53, %54 : vector<8x256xf32>
    %56 = arith.addf %31, %55 : vector<8x256xf32>
    %c17_i32 = arith.constant 17 : i32
    %57 = tpu.dynamic_rotate %56 by %c17_i32 dim 1 : vector<8x256xf32>, i32 -> vector<8x256xf32>
    %c0_36 = arith.constant 0 : index
    %c0_37 = arith.constant 0 : index
    %58 = vector.load %arg3[%c0_36, %c0_37] : memref<25x256xf32, #tpu.memory_space<vmem>>, vector<1x256xf32>
    %59 = vector.broadcast %58 : vector<1x256xf32> to vector<8x256xf32>
    %60 = arith.mulf %57, %59 : vector<8x256xf32>
    %c0_38 = arith.constant 0 : index
    %c0_39 = arith.constant 0 : index
    %61 = vector.load %arg21[%c0_38, %c0_39] : memref<200x256xf32, #tpu.memory_space<vmem>>, vector<8x256xf32>
    tpu.vector_store %arg21[%c0_38, %c0_39], %60 {strides = array<i32>} : memref<200x256xf32, #tpu.memory_space<vmem>>, vector<8x256xf32>,
    %c16_i32 = arith.constant 16 : i32
    %62 = tpu.dynamic_rotate %56 by %c16_i32 dim 1 : vector<8x256xf32>, i32 -> vector<8x256xf32>
    %c1 = arith.constant 1 : index
    %c0_40 = arith.constant 0 : index
    %63 = vector.load %arg3[%c1, %c0_40] : memref<25x256xf32, #tpu.memory_space<vmem>>, vector<1x256xf32>
    %64 = vector.broadcast %63 : vector<1x256xf32> to vector<8x256xf32>
    %65 = arith.mulf %62, %64 : vector<8x256xf32>
    %c8 = arith.constant 8 : index
    %c0_41 = arith.constant 0 : index
    %66 = vector.load %arg21[%c8, %c0_41] : memref<200x256xf32, #tpu.memory_space<vmem>>, vector<8x256xf32>
    tpu.vector_store %arg21[%c8, %c0_41], %65 {strides = array<i32>} : memref<200x256xf32, #tpu.memory_space<vmem>>, vector<8x256xf32>,
    %c15_i32 = arith.constant 15 : i32
    %67 = tpu.dynamic_rotate %56 by %c15_i32 dim 1 : vector<8x256xf32>, i32 -> vector<8x256xf32>
    %c2 = arith.constant 2 : index
    %c0_42 = arith.constant 0 : index
    %68 = vector.load %arg3[%c2, %c0_42] : memref<25x256xf32, #tpu.memory_space<vmem>>, vector<1x256xf32>
    %69 = vector.broadcast %68 : vector<1x256xf32> to vector<8x256xf32>
    %70 = arith.mulf %67, %69 : vector<8x256xf32>
    %c16 = arith.constant 16 : index
    %c0_43 = arith.constant 0 : index
    %71 = vector.load %arg21[%c16, %c0_43] : memref<200x256xf32, #tpu.memory_space<vmem>>, vector<8x256xf32>
    tpu.vector_store %arg21[%c16, %c0_43], %70 {strides = array<i32>} : memref<200x256xf32, #tpu.memory_space<vmem>>, vector<8x256xf32>,
    %c1_i32 = arith.constant 1 : i32
    %72 = tpu.dynamic_rotate %56 by %c1_i32 dim 1 : vector<8x256xf32>, i32 -> vector<8x256xf32>
    %c3 = arith.constant 3 : index
    %c0_44 = arith.constant 0 : index
    %73 = vector.load %arg3[%c3, %c0_44] : memref<25x256xf32, #tpu.memory_space<vmem>>, vector<1x256xf32>
    %74 = vector.broadcast %73 : vector<1x256xf32> to vector<8x256xf32>
    %75 = arith.mulf %72, %74 : vector<8x256xf32>
    %c24 = arith.constant 24 : index
    %c0_45 = arith.constant 0 : index
    %76 = vector.load %arg21[%c24, %c0_45] : memref<200x256xf32, #tpu.memory_space<vmem>>, vector<8x256xf32>
    tpu.vector_store %arg21[%c24, %c0_45], %75 {strides = array<i32>} : memref<200x256xf32, #tpu.memory_space<vmem>>, vector<8x256xf32>,
    %c32 = arith.constant 32 : index
    %c0_46 = arith.constant 0 : index
    %77 = vector.load %arg21[%c32, %c0_46] : memref<200x256xf32, #tpu.memory_space<vmem>>, vector<8x256xf32>
    tpu.vector_store %arg21[%c32, %c0_46], %56 {strides = array<i32>} : memref<200x256xf32, #tpu.memory_space<vmem>>, vector<8x256xf32>,
    %c255_i32 = arith.constant 255 : i32
    %78 = tpu.dynamic_rotate %56 by %c255_i32 dim 1 : vector<8x256xf32>, i32 -> vector<8x256xf32>
    %c5 = arith.constant 5 : index
    %c0_47 = arith.constant 0 : index
    %79 = vector.load %arg3[%c5, %c0_47] : memref<25x256xf32, #tpu.memory_space<vmem>>, vector<1x256xf32>
    %80 = vector.broadcast %79 : vector<1x256xf32> to vector<8x256xf32>
    %81 = arith.mulf %78, %80 : vector<8x256xf32>
    %c40 = arith.constant 40 : index
    %c0_48 = arith.constant 0 : index
    %82 = vector.load %arg21[%c40, %c0_48] : memref<200x256xf32, #tpu.memory_space<vmem>>, vector<8x256xf32>
    tpu.vector_store %arg21[%c40, %c0_48], %81 {strides = array<i32>} : memref<200x256xf32, #tpu.memory_space<vmem>>, vector<8x256xf32>,
    %c241_i32 = arith.constant 241 : i32
    %83 = tpu.dynamic_rotate %56 by %c241_i32 dim 1 : vector<8x256xf32>, i32 -> vector<8x256xf32>
    %c6 = arith.constant 6 : index
    %c0_49 = arith.constant 0 : index
    %84 = vector.load %arg3[%c6, %c0_49] : memref<25x256xf32, #tpu.memory_space<vmem>>, vector<1x256xf32>
    %85 = vector.broadcast %84 : vector<1x256xf32> to vector<8x256xf32>
    %86 = arith.mulf %83, %85 : vector<8x256xf32>
    %c48 = arith.constant 48 : index
    %c0_50 = arith.constant 0 : index
    %87 = vector.load %arg21[%c48, %c0_50] : memref<200x256xf32, #tpu.memory_space<vmem>>, vector<8x256xf32>
    tpu.vector_store %arg21[%c48, %c0_50], %86 {strides = array<i32>} : memref<200x256xf32, #tpu.memory_space<vmem>>, vector<8x256xf32>,
    %c240_i32 = arith.constant 240 : i32
    %88 = tpu.dynamic_rotate %56 by %c240_i32 dim 1 : vector<8x256xf32>, i32 -> vector<8x256xf32>
    %c7 = arith.constant 7 : index
    %c0_51 = arith.constant 0 : index
    %89 = vector.load %arg3[%c7, %c0_51] : memref<25x256xf32, #tpu.memory_space<vmem>>, vector<1x256xf32>
    %90 = vector.broadcast %89 : vector<1x256xf32> to vector<8x256xf32>
    %91 = arith.mulf %88, %90 : vector<8x256xf32>
    %c56 = arith.constant 56 : index
    %c0_52 = arith.constant 0 : index
    %92 = vector.load %arg21[%c56, %c0_52] : memref<200x256xf32, #tpu.memory_space<vmem>>, vector<8x256xf32>
    tpu.vector_store %arg21[%c56, %c0_52], %91 {strides = array<i32>} : memref<200x256xf32, #tpu.memory_space<vmem>>, vector<8x256xf32>,
    %c239_i32 = arith.constant 239 : i32
    %93 = tpu.dynamic_rotate %56 by %c239_i32 dim 1 : vector<8x256xf32>, i32 -> vector<8x256xf32>
    %c8_53 = arith.constant 8 : index
    %c0_54 = arith.constant 0 : index
    %94 = vector.load %arg3[%c8_53, %c0_54] : memref<25x256xf32, #tpu.memory_space<vmem>>, vector<1x256xf32>
    %95 = vector.broadcast %94 : vector<1x256xf32> to vector<8x256xf32>
    %96 = arith.mulf %93, %95 : vector<8x256xf32>
    %c64 = arith.constant 64 : index
    %c0_55 = arith.constant 0 : index
    %97 = vector.load %arg21[%c64, %c0_55] : memref<200x256xf32, #tpu.memory_space<vmem>>, vector<8x256xf32>
    tpu.vector_store %arg21[%c64, %c0_55], %96 {strides = array<i32>} : memref<200x256xf32, #tpu.memory_space<vmem>>, vector<8x256xf32>,
    %c34_i32 = arith.constant 34 : i32
    %98 = tpu.dynamic_rotate %56 by %c34_i32 dim 1 : vector<8x256xf32>, i32 -> vector<8x256xf32>
    %c9 = arith.constant 9 : index
    %c0_56 = arith.constant 0 : index
    %99 = vector.load %arg3[%c9, %c0_56] : memref<25x256xf32, #tpu.memory_space<vmem>>, vector<1x256xf32>
    %100 = vector.broadcast %99 : vector<1x256xf32> to vector<8x256xf32>
    %101 = arith.mulf %98, %100 : vector<8x256xf32>
    %c72 = arith.constant 72 : index
    %c0_57 = arith.constant 0 : index
    %102 = vector.load %arg21[%c72, %c0_57] : memref<200x256xf32, #tpu.memory_space<vmem>>, vector<8x256xf32>
    tpu.vector_store %arg21[%c72, %c0_57], %101 {strides = array<i32>} : memref<200x256xf32, #tpu.memory_space<vmem>>, vector<8x256xf32>,
    %c33_i32 = arith.constant 33 : i32
    %103 = tpu.dynamic_rotate %56 by %c33_i32 dim 1 : vector<8x256xf32>, i32 -> vector<8x256xf32>
    %c10 = arith.constant 10 : index
    %c0_58 = arith.constant 0 : index
    %104 = vector.load %arg3[%c10, %c0_58] : memref<25x256xf32, #tpu.memory_space<vmem>>, vector<1x256xf32>
    %105 = vector.broadcast %104 : vector<1x256xf32> to vector<8x256xf32>
    %106 = arith.mulf %103, %105 : vector<8x256xf32>
    %c80 = arith.constant 80 : index
    %c0_59 = arith.constant 0 : index
    %107 = vector.load %arg21[%c80, %c0_59] : memref<200x256xf32, #tpu.memory_space<vmem>>, vector<8x256xf32>
    tpu.vector_store %arg21[%c80, %c0_59], %106 {strides = array<i32>} : memref<200x256xf32, #tpu.memory_space<vmem>>, vector<8x256xf32>,
    %c32_i32 = arith.constant 32 : i32
    %108 = tpu.dynamic_rotate %56 by %c32_i32 dim 1 : vector<8x256xf32>, i32 -> vector<8x256xf32>
    %c11 = arith.constant 11 : index
    %c0_60 = arith.constant 0 : index
    %109 = vector.load %arg3[%c11, %c0_60] : memref<25x256xf32, #tpu.memory_space<vmem>>, vector<1x256xf32>
    %110 = vector.broadcast %109 : vector<1x256xf32> to vector<8x256xf32>
    %111 = arith.mulf %108, %110 : vector<8x256xf32>
    %c88 = arith.constant 88 : index
    %c0_61 = arith.constant 0 : index
    %112 = vector.load %arg21[%c88, %c0_61] : memref<200x256xf32, #tpu.memory_space<vmem>>, vector<8x256xf32>
    tpu.vector_store %arg21[%c88, %c0_61], %111 {strides = array<i32>} : memref<200x256xf32, #tpu.memory_space<vmem>>, vector<8x256xf32>,
    %c31_i32 = arith.constant 31 : i32
    %113 = tpu.dynamic_rotate %56 by %c31_i32 dim 1 : vector<8x256xf32>, i32 -> vector<8x256xf32>
    %c12 = arith.constant 12 : index
    %c0_62 = arith.constant 0 : index
    %114 = vector.load %arg3[%c12, %c0_62] : memref<25x256xf32, #tpu.memory_space<vmem>>, vector<1x256xf32>
    %115 = vector.broadcast %114 : vector<1x256xf32> to vector<8x256xf32>
    %116 = arith.mulf %113, %115 : vector<8x256xf32>
    %c96 = arith.constant 96 : index
    %c0_63 = arith.constant 0 : index
    %117 = vector.load %arg21[%c96, %c0_63] : memref<200x256xf32, #tpu.memory_space<vmem>>, vector<8x256xf32>
    tpu.vector_store %arg21[%c96, %c0_63], %116 {strides = array<i32>} : memref<200x256xf32, #tpu.memory_space<vmem>>, vector<8x256xf32>,
    %c30_i32 = arith.constant 30 : i32
    %118 = tpu.dynamic_rotate %56 by %c30_i32 dim 1 : vector<8x256xf32>, i32 -> vector<8x256xf32>
    %c13 = arith.constant 13 : index
    %c0_64 = arith.constant 0 : index
    %119 = vector.load %arg3[%c13, %c0_64] : memref<25x256xf32, #tpu.memory_space<vmem>>, vector<1x256xf32>
    %120 = vector.broadcast %119 : vector<1x256xf32> to vector<8x256xf32>
    %121 = arith.mulf %118, %120 : vector<8x256xf32>
    %c104 = arith.constant 104 : index
    %c0_65 = arith.constant 0 : index
    %122 = vector.load %arg21[%c104, %c0_65] : memref<200x256xf32, #tpu.memory_space<vmem>>, vector<8x256xf32>
    tpu.vector_store %arg21[%c104, %c0_65], %121 {strides = array<i32>} : memref<200x256xf32, #tpu.memory_space<vmem>>, vector<8x256xf32>,
    %c18_i32 = arith.constant 18 : i32
    %123 = tpu.dynamic_rotate %56 by %c18_i32 dim 1 : vector<8x256xf32>, i32 -> vector<8x256xf32>
    %c14 = arith.constant 14 : index
    %c0_66 = arith.constant 0 : index
    %124 = vector.load %arg3[%c14, %c0_66] : memref<25x256xf32, #tpu.memory_space<vmem>>, vector<1x256xf32>
    %125 = vector.broadcast %124 : vector<1x256xf32> to vector<8x256xf32>
    %126 = arith.mulf %123, %125 : vector<8x256xf32>
    %c112 = arith.constant 112 : index
    %c0_67 = arith.constant 0 : index
    %127 = vector.load %arg21[%c112, %c0_67] : memref<200x256xf32, #tpu.memory_space<vmem>>, vector<8x256xf32>
    tpu.vector_store %arg21[%c112, %c0_67], %126 {strides = array<i32>} : memref<200x256xf32, #tpu.memory_space<vmem>>, vector<8x256xf32>,
    %c14_i32 = arith.constant 14 : i32
    %128 = tpu.dynamic_rotate %56 by %c14_i32 dim 1 : vector<8x256xf32>, i32 -> vector<8x256xf32>
    %c15 = arith.constant 15 : index
    %c0_68 = arith.constant 0 : index
    %129 = vector.load %arg3[%c15, %c0_68] : memref<25x256xf32, #tpu.memory_space<vmem>>, vector<1x256xf32>
    %130 = vector.broadcast %129 : vector<1x256xf32> to vector<8x256xf32>
    %131 = arith.mulf %128, %130 : vector<8x256xf32>
    %c120 = arith.constant 120 : index
    %c0_69 = arith.constant 0 : index
    %132 = vector.load %arg21[%c120, %c0_69] : memref<200x256xf32, #tpu.memory_space<vmem>>, vector<8x256xf32>
    tpu.vector_store %arg21[%c120, %c0_69], %131 {strides = array<i32>} : memref<200x256xf32, #tpu.memory_space<vmem>>, vector<8x256xf32>,
    %c2_i32 = arith.constant 2 : i32
    %133 = tpu.dynamic_rotate %56 by %c2_i32 dim 1 : vector<8x256xf32>, i32 -> vector<8x256xf32>
    %c16_70 = arith.constant 16 : index
    %c0_71 = arith.constant 0 : index
    %134 = vector.load %arg3[%c16_70, %c0_71] : memref<25x256xf32, #tpu.memory_space<vmem>>, vector<1x256xf32>
    %135 = vector.broadcast %134 : vector<1x256xf32> to vector<8x256xf32>
    %136 = arith.mulf %133, %135 : vector<8x256xf32>
    %c128 = arith.constant 128 : index
    %c0_72 = arith.constant 0 : index
    %137 = vector.load %arg21[%c128, %c0_72] : memref<200x256xf32, #tpu.memory_space<vmem>>, vector<8x256xf32>
    tpu.vector_store %arg21[%c128, %c0_72], %136 {strides = array<i32>} : memref<200x256xf32, #tpu.memory_space<vmem>>, vector<8x256xf32>,
    %c254_i32 = arith.constant 254 : i32
    %138 = tpu.dynamic_rotate %56 by %c254_i32 dim 1 : vector<8x256xf32>, i32 -> vector<8x256xf32>
    %c17 = arith.constant 17 : index
    %c0_73 = arith.constant 0 : index
    %139 = vector.load %arg3[%c17, %c0_73] : memref<25x256xf32, #tpu.memory_space<vmem>>, vector<1x256xf32>
    %140 = vector.broadcast %139 : vector<1x256xf32> to vector<8x256xf32>
    %141 = arith.mulf %138, %140 : vector<8x256xf32>
    %c136 = arith.constant 136 : index
    %c0_74 = arith.constant 0 : index
    %142 = vector.load %arg21[%c136, %c0_74] : memref<200x256xf32, #tpu.memory_space<vmem>>, vector<8x256xf32>
    tpu.vector_store %arg21[%c136, %c0_74], %141 {strides = array<i32>} : memref<200x256xf32, #tpu.memory_space<vmem>>, vector<8x256xf32>,
    %c242_i32 = arith.constant 242 : i32
    %143 = tpu.dynamic_rotate %56 by %c242_i32 dim 1 : vector<8x256xf32>, i32 -> vector<8x256xf32>
    %c18 = arith.constant 18 : index
    %c0_75 = arith.constant 0 : index
    %144 = vector.load %arg3[%c18, %c0_75] : memref<25x256xf32, #tpu.memory_space<vmem>>, vector<1x256xf32>
    %145 = vector.broadcast %144 : vector<1x256xf32> to vector<8x256xf32>
    %146 = arith.mulf %143, %145 : vector<8x256xf32>
    %c144 = arith.constant 144 : index
    %c0_76 = arith.constant 0 : index
    %147 = vector.load %arg21[%c144, %c0_76] : memref<200x256xf32, #tpu.memory_space<vmem>>, vector<8x256xf32>
    tpu.vector_store %arg21[%c144, %c0_76], %146 {strides = array<i32>} : memref<200x256xf32, #tpu.memory_space<vmem>>, vector<8x256xf32>,
    %c238_i32 = arith.constant 238 : i32
    %148 = tpu.dynamic_rotate %56 by %c238_i32 dim 1 : vector<8x256xf32>, i32 -> vector<8x256xf32>
    %c19 = arith.constant 19 : index
    %c0_77 = arith.constant 0 : index
    %149 = vector.load %arg3[%c19, %c0_77] : memref<25x256xf32, #tpu.memory_space<vmem>>, vector<1x256xf32>
    %150 = vector.broadcast %149 : vector<1x256xf32> to vector<8x256xf32>
    %151 = arith.mulf %148, %150 : vector<8x256xf32>
    %c152 = arith.constant 152 : index
    %c0_78 = arith.constant 0 : index
    %152 = vector.load %arg21[%c152, %c0_78] : memref<200x256xf32, #tpu.memory_space<vmem>>, vector<8x256xf32>
    tpu.vector_store %arg21[%c152, %c0_78], %151 {strides = array<i32>} : memref<200x256xf32, #tpu.memory_space<vmem>>, vector<8x256xf32>,
    %c226_i32 = arith.constant 226 : i32
    %153 = tpu.dynamic_rotate %56 by %c226_i32 dim 1 : vector<8x256xf32>, i32 -> vector<8x256xf32>
    %c20 = arith.constant 20 : index
    %c0_79 = arith.constant 0 : index
    %154 = vector.load %arg3[%c20, %c0_79] : memref<25x256xf32, #tpu.memory_space<vmem>>, vector<1x256xf32>
    %155 = vector.broadcast %154 : vector<1x256xf32> to vector<8x256xf32>
    %156 = arith.mulf %153, %155 : vector<8x256xf32>
    %c160 = arith.constant 160 : index
    %c0_80 = arith.constant 0 : index
    %157 = vector.load %arg21[%c160, %c0_80] : memref<200x256xf32, #tpu.memory_space<vmem>>, vector<8x256xf32>
    tpu.vector_store %arg21[%c160, %c0_80], %156 {strides = array<i32>} : memref<200x256xf32, #tpu.memory_space<vmem>>, vector<8x256xf32>,
    %c225_i32 = arith.constant 225 : i32
    %158 = tpu.dynamic_rotate %56 by %c225_i32 dim 1 : vector<8x256xf32>, i32 -> vector<8x256xf32>
    %c21 = arith.constant 21 : index
    %c0_81 = arith.constant 0 : index
    %159 = vector.load %arg3[%c21, %c0_81] : memref<25x256xf32, #tpu.memory_space<vmem>>, vector<1x256xf32>
    %160 = vector.broadcast %159 : vector<1x256xf32> to vector<8x256xf32>
    %161 = arith.mulf %158, %160 : vector<8x256xf32>
    %c168 = arith.constant 168 : index
    %c0_82 = arith.constant 0 : index
    %162 = vector.load %arg21[%c168, %c0_82] : memref<200x256xf32, #tpu.memory_space<vmem>>, vector<8x256xf32>
    tpu.vector_store %arg21[%c168, %c0_82], %161 {strides = array<i32>} : memref<200x256xf32, #tpu.memory_space<vmem>>, vector<8x256xf32>,
    %c224_i32 = arith.constant 224 : i32
    %163 = tpu.dynamic_rotate %56 by %c224_i32 dim 1 : vector<8x256xf32>, i32 -> vector<8x256xf32>
    %c22 = arith.constant 22 : index
    %c0_83 = arith.constant 0 : index
    %164 = vector.load %arg3[%c22, %c0_83] : memref<25x256xf32, #tpu.memory_space<vmem>>, vector<1x256xf32>
    %165 = vector.broadcast %164 : vector<1x256xf32> to vector<8x256xf32>
    %166 = arith.mulf %163, %165 : vector<8x256xf32>
    %c176 = arith.constant 176 : index
    %c0_84 = arith.constant 0 : index
    %167 = vector.load %arg21[%c176, %c0_84] : memref<200x256xf32, #tpu.memory_space<vmem>>, vector<8x256xf32>
    tpu.vector_store %arg21[%c176, %c0_84], %166 {strides = array<i32>} : memref<200x256xf32, #tpu.memory_space<vmem>>, vector<8x256xf32>,
    %c223_i32 = arith.constant 223 : i32
    %168 = tpu.dynamic_rotate %56 by %c223_i32 dim 1 : vector<8x256xf32>, i32 -> vector<8x256xf32>
    %c23 = arith.constant 23 : index
    %c0_85 = arith.constant 0 : index
    %169 = vector.load %arg3[%c23, %c0_85] : memref<25x256xf32, #tpu.memory_space<vmem>>, vector<1x256xf32>
    %170 = vector.broadcast %169 : vector<1x256xf32> to vector<8x256xf32>
    %171 = arith.mulf %168, %170 : vector<8x256xf32>
    %c184 = arith.constant 184 : index
    %c0_86 = arith.constant 0 : index
    %172 = vector.load %arg21[%c184, %c0_86] : memref<200x256xf32, #tpu.memory_space<vmem>>, vector<8x256xf32>
    tpu.vector_store %arg21[%c184, %c0_86], %171 {strides = array<i32>} : memref<200x256xf32, #tpu.memory_space<vmem>>, vector<8x256xf32>,
    %c222_i32 = arith.constant 222 : i32
    %173 = tpu.dynamic_rotate %56 by %c222_i32 dim 1 : vector<8x256xf32>, i32 -> vector<8x256xf32>
    %c24_87 = arith.constant 24 : index
    %c0_88 = arith.constant 0 : index
    %174 = vector.load %arg3[%c24_87, %c0_88] : memref<25x256xf32, #tpu.memory_space<vmem>>, vector<1x256xf32>
    %175 = vector.broadcast %174 : vector<1x256xf32> to vector<8x256xf32>
    %176 = arith.mulf %173, %175 : vector<8x256xf32>
    %c192 = arith.constant 192 : index
    %c0_89 = arith.constant 0 : index
    %177 = vector.load %arg21[%c192, %c0_89] : memref<200x256xf32, #tpu.memory_space<vmem>>, vector<8x256xf32>
    tpu.vector_store %arg21[%c192, %c0_89], %176 {strides = array<i32>} : memref<200x256xf32, #tpu.memory_space<vmem>>, vector<8x256xf32>,
    %c0_90 = arith.constant 0 : index
    %c0_91 = arith.constant 0 : index
    %178 = vector.load %arg21[%c0_90, %c0_91] : memref<200x256xf32, #tpu.memory_space<vmem>>, vector<200x256xf32>
    %c0_92 = arith.constant 0 : index
    %c0_93 = arith.constant 0 : index
    %179 = vector.load %arg15[%c0_92, %c0_93] : memref<8x200xf32, #tpu.memory_space<vmem>>, vector<8x200xf32>
    %cst_94 = arith.constant dense<0.000000e+00> : vector<8x256xf32>
    %180 = tpu.matmul %179, %178, %cst_94 {dimension_numbers = #tpu.dot_dimension_numbers<[1], [0], [0], [1], [0, 0, 1, 1], [], []>} : vector<8x200xf32>, vector<200x256xf32>, vector<8x256xf32> -> vector<8x256xf32>
    %c0_95 = arith.constant 0 : index
    %c0_96 = arith.constant 0 : index
    %181 = vector.load %arg12[%c0_95, %c0_96] : memref<8x72xf32, #tpu.memory_space<vmem>>, vector<8x72xf32>
    %182 = vector.extract_strided_slice %178 {offsets = [0, 0], sizes = [72, 256], strides = [1, 1]} : vector<200x256xf32> to vector<72x256xf32>
    %cst_97 = arith.constant dense<0.000000e+00> : vector<8x256xf32>
    %183 = tpu.matmul %181, %182, %cst_97 {dimension_numbers = #tpu.dot_dimension_numbers<[1], [0], [0], [1], [0, 0, 1, 1], [], []>} : vector<8x72xf32>, vector<72x256xf32>, vector<8x256xf32> -> vector<8x256xf32>
    %c0_98 = arith.constant 0 : index
    %c0_99 = arith.constant 0 : index
    %184 = vector.load %arg16[%c0_98, %c0_99] : memref<8x1xf32, #tpu.memory_space<vmem>>, vector<8x1xf32>
    %185 = vector.broadcast %184 : vector<8x1xf32> to vector<8x256xf32>
    %186 = arith.mulf %180, %185 : vector<8x256xf32>
    %c0_100 = arith.constant 0 : index
    %c0_101 = arith.constant 0 : index
    %187 = vector.load %arg17[%c0_100, %c0_101] : memref<8x1xf32, #tpu.memory_space<vmem>>, vector<8x1xf32>
    %188 = vector.broadcast %187 : vector<8x1xf32> to vector<8x256xf32>
    %189 = arith.addf %186, %188 : vector<8x256xf32>
    %cst_102 = arith.constant 0.000000e+00 : f32
    %190 = vector.broadcast %cst_102 : f32 to vector<8x256xf32>
    %191 = arith.maximumf %189, %190 : vector<8x256xf32>
    %c0_103 = arith.constant 0 : index
    %c0_104 = arith.constant 0 : index
    %192 = vector.load %arg13[%c0_103, %c0_104] : memref<8x1xf32, #tpu.memory_space<vmem>>, vector<8x1xf32>
    %193 = vector.broadcast %192 : vector<8x1xf32> to vector<8x256xf32>
    %194 = arith.mulf %183, %193 : vector<8x256xf32>
    %c0_105 = arith.constant 0 : index
    %c0_106 = arith.constant 0 : index
    %195 = vector.load %arg14[%c0_105, %c0_106] : memref<8x1xf32, #tpu.memory_space<vmem>>, vector<8x1xf32>
    %196 = vector.broadcast %195 : vector<8x1xf32> to vector<8x256xf32>
    %197 = arith.addf %194, %196 : vector<8x256xf32>
    %cst_107 = arith.constant 0.000000e+00 : f32
    %198 = vector.broadcast %cst_107 : f32 to vector<8x256xf32>
    %199 = arith.maximumf %197, %198 : vector<8x256xf32>
    %200 = arith.subf %191, %199 : vector<8x256xf32>
    %201 = arith.addf %200, %31 : vector<8x256xf32>
    %c0_108 = arith.constant 0 : index
    %c0_109 = arith.constant 0 : index
    %c0_110 = arith.constant 0 : index
    %202 = vector.load %arg18[%c0_108, %c0_109, %c0_110] : memref<1x8x256xf32, #tpu.memory_space<vmem>>, vector<1x8x256xf32>
    %203 = vector.shape_cast %202 : vector<1x8x256xf32> to vector<8x256xf32>
    %204 = vector.shape_cast %201 : vector<8x256xf32> to vector<1x8x256xf32>
    tpu.vector_store %arg18[%c0_108, %c0_109, %c0_110], %204 {strides = array<i32>} : memref<1x8x256xf32, #tpu.memory_space<vmem>>, vector<1x8x256xf32>,
    %c0_111 = arith.constant 0 : index
    %c0_112 = arith.constant 0 : index
    %c0_113 = arith.constant 0 : index
    %205 = vector.load %arg19[%c0_111, %c0_112, %c0_113] : memref<1x8x256xf32, #tpu.memory_space<vmem>>, vector<1x8x256xf32>
    %206 = vector.shape_cast %205 : vector<1x8x256xf32> to vector<8x256xf32>
    %207 = vector.shape_cast %200 : vector<8x256xf32> to vector<1x8x256xf32>
    tpu.vector_store %arg19[%c0_111, %c0_112, %c0_113], %207 {strides = array<i32>} : memref<1x8x256xf32, #tpu.memory_space<vmem>>, vector<1x8x256xf32>,
    %c0_114 = arith.constant 0 : index
    %c0_115 = arith.constant 0 : index
    %c0_116 = arith.constant 0 : index
    %208 = vector.load %arg20[%c0_114, %c0_115, %c0_116] : memref<1x8x256xf32, #tpu.memory_space<vmem>>, vector<1x8x256xf32>
    %209 = vector.shape_cast %208 : vector<1x8x256xf32> to vector<8x256xf32>
    %210 = vector.shape_cast %55 : vector<8x256xf32> to vector<1x8x256xf32>
    tpu.vector_store %arg20[%c0_114, %c0_115, %c0_116], %210 {strides = array<i32>} : memref<1x8x256xf32, #tpu.memory_space<vmem>>, vector<1x8x256xf32>,
    return
  }
  func.func @transform_0(%arg0: i32) -> (i32, i32, i32) {
    %c0_i32 = arith.constant 0 : i32
    %c0_i32_0 = arith.constant 0 : i32
    %c0_i32_1 = arith.constant 0 : i32
    return %arg0, %c0_i32, %c0_i32_0 : i32, i32, i32
  }
  func.func @transform_1(%arg0: i32) -> (i32, i32, i32) {
    %c0_i32 = arith.constant 0 : i32
    %c0_i32_0 = arith.constant 0 : i32
    %c0_i32_1 = arith.constant 0 : i32
    return %arg0, %c0_i32, %c0_i32_0 : i32, i32, i32
  }
  func.func @transform_2(%arg0: i32) -> (i32, i32) {
    %c0_i32 = arith.constant 0 : i32
    %c0_i32_0 = arith.constant 0 : i32
    %c0_i32_1 = arith.constant 0 : i32
    return %c0_i32, %c0_i32_0 : i32, i32
  }
  func.func @transform_3(%arg0: i32) -> (i32, i32) {
    %c0_i32 = arith.constant 0 : i32
    %c0_i32_0 = arith.constant 0 : i32
    %c0_i32_1 = arith.constant 0 : i32
    return %c0_i32, %c0_i32_0 : i32, i32
  }
  func.func @transform_4(%arg0: i32) -> (i32, i32) {
    %c0_i32 = arith.constant 0 : i32
    %c0_i32_0 = arith.constant 0 : i32
    %c0_i32_1 = arith.constant 0 : i32
    return %c0_i32, %c0_i32_0 : i32, i32
  }
  func.func @transform_5(%arg0: i32) -> (i32, i32) {
    %c0_i32 = arith.constant 0 : i32
    %c0_i32_0 = arith.constant 0 : i32
    %c0_i32_1 = arith.constant 0 : i32
    return %c0_i32, %c0_i32_0 : i32, i32
  }
  func.func @transform_6(%arg0: i32) -> (i32, i32) {
    %c0_i32 = arith.constant 0 : i32
    %c0_i32_0 = arith.constant 0 : i32
    %c0_i32_1 = arith.constant 0 : i32
    return %c0_i32, %c0_i32_0 : i32, i32
  }
  func.func @transform_7(%arg0: i32) -> (i32, i32) {
    %c0_i32 = arith.constant 0 : i32
    %c0_i32_0 = arith.constant 0 : i32
    %c0_i32_1 = arith.constant 0 : i32
    return %c0_i32, %c0_i32_0 : i32, i32
  }
  func.func @transform_8(%arg0: i32) -> (i32, i32) {
    %c0_i32 = arith.constant 0 : i32
    %c0_i32_0 = arith.constant 0 : i32
    %c0_i32_1 = arith.constant 0 : i32
    return %c0_i32, %c0_i32_0 : i32, i32
  }
  func.func @transform_9(%arg0: i32) -> (i32, i32) {
    %c0_i32 = arith.constant 0 : i32
    %c0_i32_0 = arith.constant 0 : i32
    %c0_i32_1 = arith.constant 0 : i32
    return %c0_i32, %c0_i32_0 : i32, i32
  }
  func.func @transform_10(%arg0: i32) -> (i32, i32) {
    %c0_i32 = arith.constant 0 : i32
    %c0_i32_0 = arith.constant 0 : i32
    %c0_i32_1 = arith.constant 0 : i32
    return %c0_i32, %c0_i32_0 : i32, i32
  }
  func.func @transform_11(%arg0: i32) -> (i32, i32) {
    %c0_i32 = arith.constant 0 : i32
    %c0_i32_0 = arith.constant 0 : i32
    %c0_i32_1 = arith.constant 0 : i32
    return %c0_i32, %c0_i32_0 : i32, i32
  }
  func.func @transform_12(%arg0: i32) -> (i32, i32) {
    %c0_i32 = arith.constant 0 : i32
    %c0_i32_0 = arith.constant 0 : i32
    %c0_i32_1 = arith.constant 0 : i32
    return %c0_i32, %c0_i32_0 : i32, i32
  }
  func.func @transform_13(%arg0: i32) -> (i32, i32) {
    %c0_i32 = arith.constant 0 : i32
    %c0_i32_0 = arith.constant 0 : i32
    %c0_i32_1 = arith.constant 0 : i32
    return %c0_i32, %c0_i32_0 : i32, i32
  }
  func.func @transform_14(%arg0: i32) -> (i32, i32) {
    %c0_i32 = arith.constant 0 : i32
    %c0_i32_0 = arith.constant 0 : i32
    %c0_i32_1 = arith.constant 0 : i32
    return %c0_i32, %c0_i32_0 : i32, i32
  }
  func.func @transform_15(%arg0: i32) -> (i32, i32) {
    %c0_i32 = arith.constant 0 : i32
    %c0_i32_0 = arith.constant 0 : i32
    %c0_i32_1 = arith.constant 0 : i32
    return %c0_i32, %c0_i32_0 : i32, i32
  }
  func.func @transform_16(%arg0: i32) -> (i32, i32) {
    %c0_i32 = arith.constant 0 : i32
    %c0_i32_0 = arith.constant 0 : i32
    %c0_i32_1 = arith.constant 0 : i32
    return %c0_i32, %c0_i32_0 : i32, i32
  }
  func.func @transform_17(%arg0: i32) -> (i32, i32, i32) {
    %c0_i32 = arith.constant 0 : i32
    %c0_i32_0 = arith.constant 0 : i32
    %c0_i32_1 = arith.constant 0 : i32
    return %arg0, %c0_i32, %c0_i32_0 : i32, i32, i32
  }
  func.func @transform_18(%arg0: i32) -> (i32, i32, i32) {
    %c0_i32 = arith.constant 0 : i32
    %c0_i32_0 = arith.constant 0 : i32
    %c0_i32_1 = arith.constant 0 : i32
    return %arg0, %c0_i32, %c0_i32_0 : i32, i32, i32
  }
  func.func @transform_19(%arg0: i32) -> (i32, i32, i32) {
    %c0_i32 = arith.constant 0 : i32
    %c0_i32_0 = arith.constant 0 : i32
    %c0_i32_1 = arith.constant 0 : i32
    return %arg0, %c0_i32, %c0_i32_0 : i32, i32, i32
  }
}

</mosaic_0001>

<bundles_post_ra>
// kernel: tpu_custom_call.1
= control target key start
LH: loop header
LB: loop body
LE: loop exit
PB: predicated region body
PF: predicated region fallthrough
CT: control target
= control target key end

     0   :  { %s4005_s0 = inlined_call_operand.vmem [shape: f32[2,8,256], index: 0, kind: input, shape index: {}]   ;;  %s4006_s1 = inlined_call_operand.hbm [shape: f32[2,8,256], index: 1, kind: input, shape index: {}]   ;;  %s4007_s2 = inlined_call_operand.vmem [shape: f32[25,256], index: 2, kind: input, shape index: {}]   ;;  %s4008_s3 = inlined_call_operand.vmem [shape: f32[24,8], index: 3, kind: input, shape index: {}]   ;;  %s4009_s4 = inlined_call_operand.vmem [shape: f32[24,1], index: 4, kind: input, shape index: {}]   ;;  %s4010_s5 = inlined_call_operand.hbm [shape: f32[8,8], index: 5, kind: input, shape index: {}]   ;;  %s4011_s6 = inlined_call_operand.vmem [shape: f32[1,8], index: 6, kind: input, shape index: {}]   ;;  %s4012_s7 = inlined_call_operand.vmem [shape: f32[16,16], index: 7, kind: input, shape index: {}]   ;;  %s4013_s8 = inlined_call_operand.vmem [shape: f32[8,16], index: 8, kind: input, shape index: {}]   ;;  %s4014_s9 = inlined_call_operand.vmem [shape: f32[8,1], index: 9, kind: input, shape index: {}]   ;;  %s4015_s10 = inlined_call_operand.vmem [shape: f32[8,1], index: 10, kind: input, shape index: {}]   ;;  %s4016_s11 = inlined_call_operand.vmem [shape: f32[8,72], index: 11, kind: input, shape index: {}]   ;;  %s4017_s12 = inlined_call_operand.vmem [shape: f32[8,1], index: 12, kind: input, shape index: {}]   ;;  %s4018_s13 = inlined_call_operand.vmem [shape: f32[8,1], index: 13, kind: input, shape index: {}]   ;;  %s4019_s14 = inlined_call_operand.vmem [shape: f32[8,200], index: 14, kind: input, shape index: {}]   ;;  %s4020_s15 = inlined_call_operand.vmem [shape: f32[8,1], index: 15, kind: input, shape index: {}]   ;;  %s4021_s16 = inlined_call_operand.vmem [shape: f32[8,1], index: 16, kind: input, shape index: {}]   ;;  %s4022_s17 = inlined_call_operand.hbm [shape: f32[2,8,256], index: 17, kind: output, shape index: {0}]   ;;  %s4023_s18 = inlined_call_operand.hbm [shape: f32[2,8,256], index: 18, kind: output, shape index: {1}]   ;;  %s4024_s19 = inlined_call_operand.hbm [shape: f32[2,8,256], index: 19, kind: output, shape index: {2}]  }
   0x1   :  { %4040 = sst [smem:[#allocation20_spill]] %s4005_s0 }
   0x2   :  { %4041 = sst [smem:[#allocation21_spill]] %s4006_s1 }
   0x3   :  { %4042 = sst [smem:[#allocation22_spill]] %s4007_s2 }
   0x4   :  { %4043 = sst [smem:[#allocation23_spill]] %s4008_s3 }
   0x5   :  { %4044 = sst [smem:[#allocation24_spill]] %s4009_s4 }
   0x6   :  { %4045 = sst [smem:[#allocation25_spill]] %s4010_s5 }
   0x7   :  { %4046 = sst [smem:[#allocation26_spill]] %s4011_s6 }
   0x8   :  { %4047 = sst [smem:[#allocation27_spill]] %s4012_s7 }
   0x9   :  { %4048 = sst [smem:[#allocation28_spill]] %s4013_s8 }
   0xa   :  { %4049 = sst [smem:[#allocation29_spill]] %s4014_s9 }
   0xb   :  { %4050 = sst [smem:[#allocation30_spill]] %s4015_s10 }
   0xc   :  { %4051 = sst [smem:[#allocation31_spill]] %s4016_s11 }
   0xd   :  { %4052 = sst [smem:[#allocation32_spill]] %s4017_s12 }
   0xe   :  { %4053 = sst [smem:[#allocation33_spill]] %s4022_s17 }
   0xf   :  { %4054 = sst [smem:[#allocation34_spill]] %s4023_s18 }
  0x10   :  { %4055 = sst [smem:[#allocation35_spill]] %s4024_s19 }
  0x11   :  { %25 = vsyncpa [#allocation4], 0 }
  0x12   :  { %27 = vsyncpa [#allocation4 + $0x1], 0 }
  0x13   :  { %28 = vsyncpa [#allocation7], 0 }
  0x14   :  { %29 = vsyncpa [#allocation5], 0 }
  0x15   :  { %31 = vsyncpa [#allocation5 + $0x1], 0 }
  0x16   :  { %32 = vsyncpa [#allocation10], 0 }
  0x17   :  { %34 = vsyncpa [#allocation10 + $0x1], 0  ;;  %s3344_s0 = smov 0   ;;  %s3346_s30 = smov 0  }
  0x18   :  { %s3348_s20 = smov 0   ;;  %s3350_s21 = smov 0  }
  0x19 LB: > { %4056 = sst [smem:[#allocation16_spill]] %s3199_s0  ;;  %s3365_s1 = sadd.s32 4294967295, %s3211_s21   ;;  %s3211_s21 = sphi %s3350_s21, %s4098_s21   ;;  %s3207_s20 = sphi %s3348_s20, %s4102_s20   ;;  %s3203_s30 = sphi %s3346_s30, %s4101_s30   ;;  %s3199_s0 = sphi %s3344_s0, %s4100_s0  }
  0x1a   : > { %s4028_s22 = sadd.s32 4294967294, %s3211_s21   ;;  %p86_p0 = scmp.ne.s32.totalorder %s3203_s30, %s3199_s0 }
  0x1b   : > { %p4036_p1 = scmp.eq.s32.totalorder %s3365_s1, 0  ;;  %p431_p3 = scmp.eq.s32.totalorder %s4028_s22, 1 }
  0x1c   : > { %p2734_p5 = scmp.ge.s32.totalorder %s3211_s21, 1  ;;  %p490_p7 = scmp.lt.s32.totalorder %s3211_s21, 3 }
  0x1d   : > { %p3376_p4 = por %p4036_p1, %p86_p0  ;;  %p3381_p6 = por %p431_p3, %p86_p0 }
  0x1e   : > { %p3386_p8 = pnand %p2734_p5, %p490_p7  ;;  %s3213_s25 = smov [#allocation6]  }
  0x1f   : > { %s4057_s2 = scalar_select %p3376_p4, 1, 0 }
  0x20   : > { %s4058_s23 = scalar_select %p3381_p6, 1, 0 }
  0x21   : > { %s4060_s24 = scalar_select %p3386_p8, 1, 0 }
  0x22   : > { %4059 = sst [smem:[#allocation17_spill]] %s4058_s23  ;;  %s512_s3 = sshll.u32 %s3213_s25, 4  ;;  %s513_s3 = int_to_ptr.vmem [resolvable:$true] %s512_s3 }
  0x23   : > { %p2940_p10 = pneg %p3386_p8  ;;  %s3394_s26 = sadd.s32 1, %s3211_s21  }
  0x24   : > { %4061 = sst [smem:[#allocation18_spill]] %s3394_s26  ;;  %s70_s28 = ssub.s32 %s3211_s21, %s3394_s26 }
  0x25   : > { %p3398_p11 = pnand %p2940_p10, %p4036_p1  ;;  %p3404_p12 = scmp.eq.s32.totalorder %s70_s28, 0 }
  0x26   : > { %s73_s22 = sadd.s32 1, %s3207_s20  ;;  %s4064_s5 = sld [smem:[#allocation25_spill]] }
  0x27   : > { %s4063_s29 = scalar_select %p3404_p12, 1, 0 }
  0x28   : > { %p3025_p3 = pneg %p3398_p11 }
  0x2c   : > { %s3023_s0 = scalar_lea.hbm %s4064_s5, 128 }
  0x2d   : > { %p3024_p0 = scmp.ne.s32.totalorder %s4064_s5, %s3023_s0  ;;  %p3030_p10 = scmp.lt.u32.totalorder %s3023_s0, %s4064_s5 }
  0x2f   : > { %p3026_p5 = pnand %p3025_p3, %p3024_p0 }
  0x31   : > { %p3027_p7 = pneg %p3026_p5 }
  0x33   : > { %p3032_p9 = pnand %p3030_p10, %p3027_p7 }
  0x35   : > { %3035 = shalt.err (!%p3032_p9)
}
  0x36   : > { %s3036_s28 = scalar_lea.vmem %s513_s3, 128  ;;  %p3044_p6 = scmp.lt.s32.totalorder %s513_s3, %s513_s3 }
  0x37   : > { %p3037_p1 = scmp.ne.s32.totalorder %s513_s3, %s3036_s28  ;;  %p3045_p4 = scmp.lt.s32.totalorder %s3036_s28, %s3036_s28 }
  0x39   : > { %p3039_p2 = pnand %p3037_p1, %p3025_p3  ;;  %p3046_p8 = por %p3045_p4, %p3044_p6 }
  0x3b   : > { %p3040_p13 = pneg %p3039_p2 }
  0x3d   : > { %p3047_p12 = pnand %p3046_p8, %p3040_p13 }
  0x3f   : > { %3050 = shalt.err (!%p3047_p12)
}
  0x40   : > { %2943 = dma.hbm_to_vmem [thread:$0]  (!%p3398_p11), %s4064_s5, 128, %s513_s3, [#allocation7]  }
  0x41   : > { %p4065_p1 = scmp.ne.s32.totalorder %s4063_s29, 0  ;;  %p81_p2 = scmp.eq.s32.totalorder %s3211_s21, 0 }
  0x42   : > { %p4067_p4 = scmp.ne.s32.totalorder %s3207_s20, %s3203_s30  ;;  %p4068_p6 = scmp.eq.s32.totalorder %s3365_s1, 1 }
  0x43   : > { %s3430_s18 = scalar_select %p4065_p1, %s3207_s20, %s73_s22  }
  0x44   : > { %p3438_p8 = por %p4068_p6, %p4067_p4  ;;  %p2959_p9 = scmp.lt.s32.totalorder %s3211_s21, 2 }
  0x45   : > { %4066 = sst [smem:[#allocation19_spill]] %s3430_s18  ;;  %s564_s23 = sand.u32 1, %s3207_s20  }
  0x46   : > { %p4070_p12 = pmov %p4067_p4  ;;  %s2737_s26 = sshll.u32 %s564_s23, 4 }
  0x47   : > { %s2805_s27 = sshll.u32 %s3211_s21, 8  ;;  %s4071_s17 = sld [smem:[#allocation21_spill]] }
  0x48   : > { %p82_p13 = por %p81_p2, %p4070_p12  ;;  %s568_s22 = scalar_lea.vmem [#allocation3], %s2737_s26 }
  0x49   : > { %s576_s29 = sshll.u32 %s568_s22, 4  ;;  %s565_s5 = scalar_lea.sflag [#allocation4], %s564_s23  ;;  %s3457_s29 = int_to_ptr.vmem [resolvable:$true] %s576_s29 }
  0x4a   : > { %p3453_p11 = pnand %p2959_p9, %p82_p13 }
  0x4c   : > { %p3053_p3 = pneg %p3453_p11 }
  0x4d   : > { %s3451_s3 = scalar_lea.hbm %s4071_s17, %s2805_s27  ;;  %s3056_s25 = scalar_lea.hbm %s4071_s17, 512 }
  0x4e   : > { %s3051_s18 = scalar_lea.hbm %s3451_s3, 256  ;;  %p3057_p10 = scmp.lt.u32.totalorder %s3451_s3, %s4071_s17 }
  0x4f   : > { %p3052_p0 = scmp.ne.s32.totalorder %s3451_s3, %s3051_s18  ;;  %p3058_p1 = scmp.lt.u32.totalorder %s3056_s25, %s3051_s18 }
  0x50   : > { %p3060_p4 = scmp.lt.u32.totalorder %s3051_s18, %s3451_s3 }
  0x51   : > { %p3054_p5 = pnand %p3053_p3, %p3052_p0  ;;  %p3059_p2 = por %p3058_p1, %p3057_p10 }
  0x53   : > { %p3055_p7 = pneg %p3054_p5  ;;  %p3061_p6 = por %p3060_p4, %p3059_p2 }
  0x55   : > { %p3062_p9 = pnand %p3061_p6, %p3055_p7 }
  0x57   : > { %3065 = shalt.err (!%p3062_p9)
}
  0x58   : > { %s3066_s23 = scalar_lea.vmem %s3457_s29, 256  ;;  %s3214_s27 = smov [#allocation3]  }
  0x59   : > { %p3067_p12 = scmp.ne.s32.totalorder %s3457_s29, %s3066_s23  ;;  %s3071_s26 = sshll.u32 %s3214_s27, 4  ;;  %s3072_s26 = int_to_ptr.vmem [resolvable:$false] %s3071_s26 }
  0x5a   : > { %s3073_s28 = scalar_lea.vmem %s3072_s26, 512  ;;  %p3074_p5 = scmp.lt.s32.totalorder %s3457_s29, %s3072_s26 }
  0x5b   : > { %p3069_p13 = pnand %p3067_p12, %p3053_p3  ;;  %p3075_p10 = scmp.lt.s32.totalorder %s3073_s28, %s3066_s23 }
  0x5d   : > { %p3070_p0 = pneg %p3069_p13  ;;  %p3076_p1 = por %p3075_p10, %p3074_p5 }
  0x5f   : > { %p3077_p2 = pnand %p3076_p1, %p3070_p0 }
  0x61   : > { %3080 = shalt.err (!%p3077_p2)
}
  0x62   : > { %2947 = dma.hbm_to_vmem [thread:$0]  (!%p3453_p11), %s3451_s3, 256, %s3457_s29, %s565_s5  }
  0x63   : > { %p4073_p7 = scmp.ne.s32.totalorder %s4060_s24, 0 }
  0x64   : > { %s3487_s18 = sand.u32 (!%p4073_p7), 1, %s3203_s30   ;;  %p4074_p3 = scmp.ne.s32.totalorder (!%p4073_p7), %s4057_s2, 0 }
  0x65   : > { %585 = sbr.rel (%p4073_p7) target bundleno = 3053 (0xbed), region = 88  ;;  %s3490_s25 = sshll.u32 (!%p4073_p7), %s3487_s18, 4 }
  0x66   : > { %s588_s22 = scalar_lea.sflag (!%p4073_p7), [#allocation4], %s3487_s18 }
  0x6c   : > { %3182 = dma.done.wait (%p4074_p3), %s588_s22, 256  }
  0x6d   : > { %3184 = vsyncadd (%p4074_p3), %s588_s22, 4294967040  ;;  %p4075_p11 = scmp.eq.s32.totalorder %s3365_s1, 0 }
  0x6f   : > { %3186 = dma.done.wait (%p4075_p11), [#allocation7], 128   ;;  %p4076_p4 = pmov %p4075_p11 }
  0x70   : > { %p665_p6 = scmp.lt.s32.totalorder %s3365_s1, 1  ;;  %v3215_v0 = vmov 0.0   ;;  %v3216_v1 = vmov 0   ;;  %s4077_s29 = sld [smem:[#allocation20_spill]]  ;;  %vm700_vm0 = vcmask 64512   ;;  %v3565_v27 = vld [vmem:[#allocation6] sm:$0xff] }
  0x71   : > { %3188 = vsyncadd (%p4076_p4), [#allocation7], 4294967168  ;;  %774 = vmatprep.mubr.f32.mxu0 %v3215_v0  ;;  %3021 = vset.pattern.permute.xlu0 %v3216_v1  ;;  %s4078_s28 = sld [smem:[#allocation23_spill]]  ;;  %s4079_s4 = sld [smem:[#allocation24_spill]]  ;;  %vm961_vm1 = vcmask 130048   ;;  %vm2331_vm2 = vcmask 588800  }
  0x72   : > { %s666_s5 = scalar_select %p665_p6, %s3365_s1, 1  ;;  %3022 = vset.pattern.permute.xlu1 %v3216_v1  ;;  %1113 = vmatprep.mubr.f32.mxu1 %v3215_v0 }
  0x73   : > { %s4080_s9 = sld [smem:[#allocation29_spill]]  ;;  %s4081_s10 = sld [smem:[#allocation30_spill]] }
  0x74   : > { %s2806_s2 = sshll.u32 %s666_s5, 4  ;;  %s4082_s7 = sld [smem:[#allocation27_spill]] }
  0x75   : > { %s4083_s6 = sld [smem:[#allocation26_spill]]  ;;  %s4084_s26 = scalar_lea.vmem [#allocation3], %s3490_s25 }
  0x76   : > { %s669_s19 = scalar_lea.vmem %s4077_s29, %s2806_s2  ;;  %v3595_v54 = vld [vmem:[%s4084_s26 + $0x8] sm:$0xff]  ;;  %s4085_s8 = sld [smem:[#allocation28_spill]] }
  0x77   : > { %v3509_v2 = vld [vmem:[%s669_s19 + $0x8] sm:$0xff]  ;;  %v3511_v3 = vld [vmem:[%s669_s19] sm:$0xff]  ;;  %v675_v5 = vld [vmem:[%s4079_s4 + $0x10] sm:$0xff]  ;;  %s4086_s2 = smov %s4084_s26  ;;  %s3654_s24 = scalar_lea.vmem [#allocation11], %s3490_s25 }
  0x78   : > { %v3516_v4 = vld [vmem:[%s4078_s28] sm:$0xff]  ;;  %710 = vmatprep.subr.mxu0 %v3509_v2  ;;  %697 = vperm.xlu0 %3021, %v675_v5   ;;  %v674_v6 = vld [vmem:[%s4079_s4 + $0x8] sm:$0xff]  ;;  %v3549_v11 = vld [vmem:[%s4078_s28 + $0x10] sm:$0xff]  ;;  %s3217_s3 = smov 17   ;;  %s3218_s29 = smov 16  }
  0x79   : > { %711 = vmatpush1.msra.mxu0 %v3511_v3  ;;  %v673_v7 = vld [vmem:[%s4079_s4] sm:$0xff]  ;;  %692 = vperm.xlu1 %3022, %v674_v6   ;;  %v3535_v8 = vld [vmem:[%s4078_s28 + $0x8] sm:$0xff]  ;;  %s3219_s23 = smov 15   ;;  %s3220_s19 = smov 1  }
  0x7a   : > { %2748 = vmatmul.mubr.msk.f32.vlgmr.msra.gmra.mrb[0].mxu0 %vm700_vm0, %v3516_v4  ;;  %v681_v9 = vld [vmem:[%s4080_s9] sm:$0xff]  ;;  %v3585_v45 = vld [vmem:[%s4082_s7 + $0x8] sm:$0xff]  ;;  %s3221_s27 = smov 127   ;;  %s3222_s26 = smov 113  }
  0x7b   : > { %780 = vmatprep.mubr.f32.mxu0 %v3215_v0  ;;  %v682_v10 = vld [vmem:[%s4081_s10] sm:$0xff]  ;;  %s3223_s22 = smov 112   ;;  %s3224_s5 = smov 111  }
  0x7c   : > { %687 = vperm.xlu0 %3021, %v673_v7   ;;  %v678_v34 = vld [vmem:[%s4082_s7] sm:$0xff]  ;;  %s4087_s12 = sld [smem:[#allocation32_spill]]  ;;  %s4089_s11 = sld [smem:[#allocation31_spill]] }
  0x7d   : > { %1202 = vperm.xlu1 %3022, %v681_v9   ;;  %v3578_v35 = vld [vmem:[%s4083_s6] ss:$0 sm:$0xff]  ;;  %s3894_s4 = scalar_lea.vmem [#allocation8], %s3490_s25  ;;  %s4091_s7 = sld [smem:[#allocation35_spill]] }
  0x7e   : > { %2749 = vmatmul.mubr.msk.f32.gmra.mrb[2].mxu0 %vm700_vm0, %v3535_v8  ;;  %v3600_v55 = vld [vmem:[%s4085_s8] sm:$0xff]  ;;  %s2552_s6 = sshll.u32 %s3894_s4, 4  ;;  %s4092_s8 = sld [smem:[#allocation33_spill]]  ;;  %s3913_s6 = int_to_ptr.vmem [resolvable:$true] %s2552_s6 }
  0x7f   : > { %786 = vmatprep.mubr.f32.mxu0 %v3215_v0  ;;  %v3605_v56 = vld [vmem:[%s4086_s2] sm:$0xff]  ;;  %s3225_s2 = smov 34  }
  0x80   : > { %1211 = vperm.xlu0 %3021, %v682_v10  }
  0x82   : > { %2750 = vmatmul.mubr.msk.f32.gmra.mrb[4].mxu0 %vm700_vm0, %v3549_v11 }
  0xf7   : > { %v3553_v12 = vpop.permute.xlu0 %697 }
  0xf8   : > { %v3560_v23 = vpop.permute.xlu1 %692 }
  0xfb   : > { %v3555_v13 = vpop.permute.xlu0 %687 }
 0x14d   : > { %v776_v14 = vpop.f32.mrb[0].mxu0 }
 0x14e   : > { %v778_v15 = vpop.f32.mrb[1].mxu0  ;;  %v777_v24 = vadd.f32 %v776_v14, %v3555_v13 }
 0x14f   : > { %v779_v16 = vadd.f32 %v778_v15, %v3555_v13 }
 0x151   : > { %v782_v17 = vpop.f32.mrb[2].mxu0  ;;  %857 = vmatprep.mubr.f32.mxu0 %v779_v16 }
 0x152   : > { %v784_v18 = vpop.f32.mrb[3].mxu0  ;;  %v783_v26 = vadd.f32 %v782_v17, %v3560_v23 }
 0x153   : > { %v785_v25 = vadd.f32 %v784_v18, %v3560_v23 }
 0x155   : > { %v788_v19 = vpop.f32.mrb[4].mxu0 }
 0x156   : > { %v790_v20 = vpop.f32.mrb[5].mxu0  ;;  %v789_v22 = vadd.f32 %v788_v19, %v3553_v12 }
 0x157   : > { %v791_v21 = vadd.f32 %v790_v20, %v3553_v12 }
 0x159   : > { %793 = vmatprep.subr.mxu0 %v791_v21  ;;  %1049 = vmatprep.subr.mxu1 %v791_v21 }
 0x15a   : > { %794 = vmatpush1.xpose.msra.mxu0 %v789_v22  ;;  %1050 = vmatpush1.msra.mxu1 %v789_v22 }
 0x15b   : > { %2824 = vmatprep.subr.mxu0 %v3565_v27 }
 0x15d   : > { %858 = vmatmul.mubr.f32.vlgmr.msra.gmra.mrb[6].mxu0 %v777_v24 }
 0x15e   : > { %862 = vmatprep.mubr.f32.mxu0 %v785_v25  ;;  %2825 = vmatpush3.msra.mxu0 %v3565_v27 }
 0x161   : > { %863 = vmatmul.mubr.f32.gmra.mrb[8].mxu0 %v783_v26 }
 0x230   : > { %v859_v28 = vpop.f32.mrb[6].mxu0 }
 0x231   : > { %v868_v29 = vmul.f32 0.00390625, %v859_v28  ;;  %v861_v30 = vpop.f32.mrb[7].mxu0 }
 0x233   : > { %2826 = vmatprep.mubr.msk.f32.mxu0 %vm700_vm0, %v868_v29 }
 0x234   : > { %v864_v31 = vpop.f32.mrb[8].mxu0 }
 0x235   : > { %v869_v32 = vmul.f32 0.00390625, %v864_v31  ;;  %v866_v33 = vpop.f32.mrb[9].mxu0 }
 0x236   : > { %v1203_v33 = vpop.permute.xlu1 %1202 }
 0x237   : > { %2827 = vmatmul.mubr.msk.f32.vlgmr.msra.gmra.mrb[10].mxu0 %vm700_vm0, %v869_v32 }
 0x238   : > { %2833 = vmatprep.mubr.msk.f32.mxu0 %vm961_vm1, %v678_v34 }
 0x30a   : > { %v2828_v36 = vpop.f32.mrb[10].mxu0 }
 0x30b   : > { %v954_v37 = vadd.f32 %v2828_v36, %v3578_v35  ;;  %v948_v38 = vpop.f32.mrb[11].mxu0 }
 0x30c   : > { %v949_v39 = vadd.f32 %v3578_v35, %v948_v38 }
 0x30d   : > { %v958_v40 = vadd.f32 %v954_v37, %v869_v32 }
 0x30e   : > { %v957_v41 = vadd.f32 %v949_v39, %v868_v29 }
 0x30f   : > { %v960_v42 = vmax.f32 %v958_v40, 0.0 }
 0x310   : > { %v959_v43 = vmax.f32 %v957_v41, 0.0 }
 0x312   : > { %v2848_v44 = vpack.c.bf16 %v960_v42, %v959_v43  ;;  %v1212_v43 = vpop.permute.xlu0 %1211 }
 0x314   : > { %2849 = vmatprep.subr.bf16.mxu0 %v2848_v44 }
 0x315   : > { %2851 = vmatpush3.bf16.msra.mxu0 %v2848_v44 }
 0x318   : > { %2834 = vmatmul.mubr.msk.f32.vlgmr.msra.gmra.mrb[12].mxu0 %vm961_vm1, %v3585_v45 }
 0x319   : > { %1193 = vmatprep.mubr.f32.mxu0 %v3215_v0 }
 0x3eb   : > { %v2835_v46 = vpop.f32.mrb[12].mxu0 }
 0x3ec   : > { %v1034_v47 = vpop.f32.mrb[13].mxu0 }
 0x3ed   : > { %2756 = vmatmul.mubr.msk.f32.vlgmr.msra.gmra.mrb[0].mxu1 %vm700_vm0, %v1034_v47 }
 0x3ee   : > { %1119 = vmatprep.mubr.f32.mxu1 %v3215_v0 }
 0x3f1   : > { %2757 = vmatmul.mubr.msk.f32.gmra.mrb[2].mxu1 %vm700_vm0, %v2835_v46 }
 0x4c0   : > { %v1115_v48 = vpop.f32.mrb[0].mxu1 }
 0x4c1   : > { %v1117_v49 = vpop.f32.mrb[1].mxu1 }
 0x4c4   : > { %v1121_v50 = vpop.f32.mrb[2].mxu1 }
 0x4c5   : > { %v2854_v51 = vpack.c.bf16 %v1121_v50, %v1115_v48  ;;  %v1123_v52 = vpop.f32.mrb[3].mxu1  ;;  %v2499_v50 = vld [vmem:[%s4087_s12] sm:$0xff] }
 0x4c6   : > { %v2852_v53 = vpack.c.bf16 %v1123_v52, %v1117_v49  ;;  %v2481_v49 = vld [vmem:[%s4020_s15] sm:$0xff] }
 0x4c7   : > { %v2507_v52 = vld [vmem:[%s4018_s13] sm:$0xff] }
 0x4c8   : > { %2853 = vmatprep.subr.bf16.mxu0 %v2852_v53  ;;  %v1704_v53 = vlaneseq }
 0x4c9   : > { %2855 = vmatpush1.bf16.msra.mxu0 %v2854_v51  ;;  %v2489_v51 = vld [vmem:[%s4021_s16] sm:$0xff] }
 0x4ca   : > { %1218 = vmatprep.subr.mxu0 %v3595_v54 }
 0x4cc   : > { %2758 = vmatmul.mubr.msk.f32.vlgmr.msra.gmra.mrb[14].mxu0 %vm961_vm1, %v3600_v55 }
 0x4cd   : > { %1219 = vmatpush1.msra.mxu0 %v3605_v56  ;;  %1282 = vmatprep.mubr.f32.mxu0 %v3215_v0 }
 0x4d0   : > { %2759 = vmatmul.mubr.msk.f32.vlgmr.msra.gmra.mrb[16].mxu0 %vm700_vm0, %v3516_v4 }
 0x4d1   : > { %1288 = vmatprep.mubr.f32.mxu0 %v3215_v0 }
 0x4d4   : > { %2760 = vmatmul.mubr.msk.f32.gmra.mrb[18].mxu0 %vm700_vm0, %v3535_v8 }
 0x4d5   : > { %1294 = vmatprep.mubr.f32.mxu0 %v3215_v0 }
 0x4d8   : > { %2761 = vmatmul.mubr.msk.f32.gmra.mrb[20].mxu0 %vm700_vm0, %v3549_v11 }
 0x4d9   : > { %2845 = vmatprep.mubr.msk.f32.mxu0 %vm961_vm1, %v678_v34 }
 0x59f   : > { %v1195_v57 = vpop.f32.mrb[14].mxu0 }
 0x5a0   : > { %v1197_v58 = vpop.f32.mrb[15].mxu0  ;;  %v1205_v34 = vmul.f32 %v1203_v33, %v1195_v57 }
 0x5a2   : > { %v1207_v37 = vadd.f32 %v1205_v34, %v3511_v3  ;;  %v2330_v3 = vld [vmem:[%s4019_s14 + $0x8] sm:$0xff] }
 0x5a3   : > { %v1284_v59 = vpop.f32.mrb[16].mxu0 }
 0x5a4   : > { %v1286_v60 = vpop.f32.mrb[17].mxu0  ;;  %v1285_v7 = vadd.f32 %v1284_v59, %v3555_v13 }
 0x5a5   : > { %v1287_v61 = vadd.f32 %v1286_v60, %v3555_v13 }
 0x5a7   : > { %v1290_v62 = vpop.f32.mrb[18].mxu0  ;;  %1365 = vmatprep.mubr.f32.mxu1 %v1287_v61 }
 0x5a8   : > { %v1292_v63 = vpop.f32.mrb[19].mxu0  ;;  %v1291_v9 = vadd.f32 %v1290_v62, %v3560_v23 }
 0x5a9   : > { %v1293_v8 = vadd.f32 %v1292_v63, %v3560_v23 }
 0x5ab   : > { %v1296_v1 = vpop.f32.mrb[20].mxu0 }
 0x5ac   : > { %v1298_v4 = vpop.f32.mrb[21].mxu0  ;;  %v1297_v6 = vadd.f32 %v1296_v1, %v3553_v12 }
 0x5ad   : > { %v1299_v5 = vadd.f32 %v1298_v4, %v3553_v12 }
 0x5af   : > { %1301 = vmatprep.subr.mxu1 %v1299_v5 }
 0x5b0   : > { %1302 = vmatpush1.xpose.msra.mxu1 %v1297_v6 }
 0x5b1   : > { %2836 = vmatprep.subr.mxu1 %v3565_v27 }
 0x5b3   : > { %1366 = vmatmul.mubr.f32.vlgmr.msra.gmra.mrb[4].mxu1 %v1285_v7 }
 0x5b4   : > { %1370 = vmatprep.mubr.f32.mxu1 %v1293_v8  ;;  %2837 = vmatpush3.msra.mxu1 %v3565_v27 }
 0x5b5   : > { %1544 = vmatprep.subr.mxu1 %v1299_v5 }
 0x5b7   : > { %1371 = vmatmul.mubr.f32.gmra.mrb[6].mxu1 %v1291_v9 }
 0x686   : > { %v1367_v10 = vpop.f32.mrb[4].mxu1 }
 0x687   : > { %v1376_v11 = vmul.f32 0.00390625, %v1367_v10  ;;  %v1369_v14 = vpop.f32.mrb[5].mxu1 }
 0x689   : > { %2838 = vmatprep.mubr.msk.f32.mxu1 %vm700_vm0, %v1376_v11 }
 0x68a   : > { %v1372_v12 = vpop.f32.mrb[6].mxu1 }
 0x68b   : > { %v1377_v15 = vmul.f32 0.00390625, %v1372_v12  ;;  %v1374_v13 = vpop.f32.mrb[7].mxu1 }
 0x68d   : > { %2839 = vmatmul.mubr.msk.f32.vlgmr.msra.gmra.mrb[8].mxu1 %vm700_vm0, %v1377_v15 }
 0x68e   : > { %1545 = vmatpush1.msra.mxu1 %v1297_v6  ;;  %1608 = vmatprep.mubr.f32.mxu1 %v3215_v0 }
 0x760   : > { %v2840_v16 = vpop.f32.mrb[8].mxu1 }
 0x761   : > { %v1456_v17 = vadd.f32 %v2840_v16, %v3578_v35  ;;  %v1450_v18 = vpop.f32.mrb[9].mxu1 }
 0x762   : > { %v1451_v19 = vadd.f32 %v3578_v35, %v1450_v18  ;;  %v1206_v35 = vmul.f32 %v1203_v33, %v1197_v58 }
 0x763   : > { %v1460_v20 = vadd.f32 %v1456_v17, %v1377_v15 }
 0x764   : > { %v1459_v21 = vadd.f32 %v1451_v19, %v1376_v11  ;;  %v1208_v40 = vadd.f32 %v1206_v35, %v3509_v2 }
 0x765   : > { %v1462_v22 = vmax.f32 %v1460_v20, 0.0 }
 0x766   : > { %v1461_v23 = vmax.f32 %v1459_v21, 0.0  ;;  %v3648_v46 = vadd.f32 %v1212_v43, %v1208_v40 }
 0x768   : > { %v2856_v24 = vpack.c.bf16 %v1462_v22, %v1461_v23 }
 0x76a   : > { %2857 = vmatprep.subr.bf16.mxu0 %v2856_v24 }
 0x76b   : > { %2859 = vmatpush3.bf16.msra.mxu0 %v2856_v24 }
 0x76e   : > { %2846 = vmatmul.mubr.msk.f32.vlgmr.msra.gmra.mrb[22].mxu0 %vm961_vm1, %v3585_v45  ;;  %v3646_v45 = vadd.f32 %v1212_v43, %v1207_v37 }
 0x76f   : > { %1685 = vmatprep.mubr.f32.mxu0 %v3215_v0 }
 0x841   : > { %v2847_v25 = vpop.f32.mrb[22].mxu0 }
 0x842   : > { %v1529_v26 = vpop.f32.mrb[23].mxu0 }
 0x843   : > { %2766 = vmatmul.mubr.msk.f32.vlgmr.msra.gmra.mrb[10].mxu1 %vm700_vm0, %v1529_v26 }
 0x844   : > { %1614 = vmatprep.mubr.f32.mxu1 %v3215_v0 }
 0x847   : > { %2767 = vmatmul.mubr.msk.f32.gmra.mrb[12].mxu1 %vm700_vm0, %v2847_v25 }
 0x848   : > { %2792 = vmatprep.mubr.msk.f32.mxu1 %vm2331_vm2, %v2330_v3 }
 0x916   : > { %v1610_v27 = vpop.f32.mrb[10].mxu1 }
 0x917   : > { %v1612_v28 = vpop.f32.mrb[11].mxu1 }
 0x91a   : > { %v1616_v29 = vpop.f32.mrb[12].mxu1 }
 0x91b   : > { %v2862_v30 = vpack.c.bf16 %v1616_v29, %v1610_v27  ;;  %v1618_v31 = vpop.f32.mrb[13].mxu1 }
 0x91c   : > { %v2860_v32 = vpack.c.bf16 %v1618_v31, %v1612_v28 }
 0x91e   : > { %2861 = vmatprep.subr.bf16.mxu0 %v2860_v32 }
 0x91f   : > { %2863 = vmatpush1.bf16.msra.mxu0 %v2862_v30 }
 0x922   : > { %2768 = vmatmul.mubr.msk.f32.vlgmr.msra.gmra.mrb[24].mxu0 %vm961_vm1, %v3600_v55  ;;  %v3725_v55 = vand.u32 127, %v1704_v53 }
 0x923   : > { %2474 = vmatprep.mubr.f32.mxu0 %v3215_v0 }
 0x924   : > { %vm1706_vm3 = vcmp.lt.s32.totalorder %v3725_v55, 17  ;;  %vm1729_vm4 = vcmp.lt.s32.totalorder %v3725_v55, 16  ;;  %vm1753_vm5 = vcmp.lt.s32.totalorder %v3725_v55, 15  ;;  %vm1777_vm6 = vcmp.lt.s32.totalorder %v3725_v55, 1 }
 0x925   : > { %vm1803_vm7 = vcmp.lt.s32.totalorder %v3725_v55, 127  ;;  %vm1827_vm8 = vcmp.lt.s32.totalorder %v3725_v55, 113  ;;  %vm1851_vm9 = vcmp.lt.s32.totalorder %v3725_v55, 112  ;;  %vm1875_vm10 = vcmp.lt.s32.totalorder %v3725_v55, 111 }
 0x926   : > { %vm1899_vm11 = vcmp.lt.s32.totalorder %v3725_v55, 34  ;;  %vm1923_vm12 = vcmp.lt.s32.totalorder %v3725_v55, 33  ;;  %vm1947_vm13 = vcmp.lt.s32.totalorder %v3725_v55, 32  ;;  %vm1971_vm14 = vcmp.lt.s32.totalorder %v3725_v55, 31 }
 0x927   : > { %vm1995_vm15 = vcmp.lt.s32.totalorder %v3725_v55, 30  ;;  %vm2019_vm0 = vcmp.lt.s32.totalorder %v3725_v55, 18  ;;  %vm2043_vm1 = vcmp.lt.s32.totalorder %v3725_v55, 14 }
 0x9f5   : > { %v1687_v36 = vpop.f32.mrb[24].mxu0 }
 0x9f6   : > { %v1692_v38 = vmul.f32 %v1687_v36, %v1203_v33  ;;  %v1689_v39 = vpop.f32.mrb[25].mxu0 }
 0x9f7   : > { %v1693_v41 = vmul.f32 %v1689_v39, %v1203_v33 }
 0x9f8   : > { %v1694_v42 = vadd.f32 %v1692_v38, %v3605_v56 }
 0x9f9   : > { %v1695_v44 = vadd.f32 %v1693_v41, %v3595_v54  ;;  %v1712_v54 = vshrl.u32 %v1704_v53, 7 }
 0x9fa   : > { %v1696_v0 = vadd.f32 %v1694_v42, %v1212_v43 }
 0x9fb   : > { %v1697_v47 = vadd.f32 %v1695_v44, %v1212_v43  ;;  %v3727_v56 = vsub.s32 0, %v1712_v54  ;;  %v3732_v58 = vsub.s32 1, %v1712_v54 }
 0x9fc   : > { %v3651_v48 = vadd.f32 %v1696_v0, %v3646_v45  ;;  %2525 = vst [vmem:[%s3654_s24] sm:$0xff] %v1696_v0 }
 0x9fd   : > { %v3658_v2 = vadd.f32 %v1697_v47, %v3648_v46  ;;  %2526 = vst [vmem:[%s3654_s24 + $0x8] sm:$0xff] %v1697_v47 }
 0x9fe   : > { %1700 = vrot.lane.b32.xlu1 %v3651_v48, %s3217_s3 }
 0x9ff   : > { %1702 = vrot.lane.b32.xlu0 %v3658_v2, %s3217_s3  ;;  %s3226_s3 = smov 33  }
 0xa02   : > { %1725 = vrot.lane.b32.xlu1 %v3651_v48, %s3218_s29 }
 0xa03   : > { %1727 = vrot.lane.b32.xlu0 %v3658_v2, %s3218_s29  ;;  %s3227_s29 = smov 32  }
 0xa06   : > { %1749 = vrot.lane.b32.xlu1 %v3651_v48, %s3219_s23 }
 0xa07   : > { %1751 = vrot.lane.b32.xlu0 %v3658_v2, %s3219_s23  ;;  %s3228_s23 = smov 31  }
 0xa0a   : > { %1773 = vrot.lane.b32.xlu1 %v3651_v48, %s3220_s19 }
 0xa0b   : > { %1775 = vrot.lane.b32.xlu0 %v3658_v2, %s3220_s19  ;;  %s3229_s19 = smov 30  }
 0xa0e   : > { %1799 = vrot.lane.b32.xlu1 %v3651_v48, %s3221_s27 }
 0xa0f   : > { %1801 = vrot.lane.b32.xlu0 %v3658_v2, %s3221_s27  ;;  %s3230_s27 = smov 18  }
 0xa12   : > { %1823 = vrot.lane.b32.xlu1 %v3651_v48, %s3222_s26 }
 0xa13   : > { %1825 = vrot.lane.b32.xlu0 %v3658_v2, %s3222_s26  ;;  %s3231_s26 = smov 14  }
 0xa16   : > { %1847 = vrot.lane.b32.xlu1 %v3651_v48, %s3223_s22 }
 0xa17   : > { %1849 = vrot.lane.b32.xlu0 %v3658_v2, %s3223_s22  ;;  %s3232_s22 = smov 2  }
 0xa1a   : > { %1871 = vrot.lane.b32.xlu1 %v3651_v48, %s3224_s5 }
 0xa1b   : > { %1873 = vrot.lane.b32.xlu0 %v3658_v2, %s3224_s5  ;;  %s3233_s5 = smov 126  }
 0xa1e   : > { %1895 = vrot.lane.b32.xlu1 %v3651_v48, %s3225_s2 }
 0xa1f   : > { %1897 = vrot.lane.b32.xlu0 %v3658_v2, %s3225_s2  ;;  %s3234_s2 = smov 114  }
 0xa22   : > { %1919 = vrot.lane.b32.xlu1 %v3651_v48, %s3226_s3 }
 0xa23   : > { %1921 = vrot.lane.b32.xlu0 %v3658_v2, %s3226_s3  ;;  %s3235_s3 = smov 110  }
 0xa26   : > { %1943 = vrot.lane.b32.xlu1 %v3651_v48, %s3227_s29 }
 0xa27   : > { %1945 = vrot.lane.b32.xlu0 %v3658_v2, %s3227_s29  ;;  %s3236_s29 = smov 98  }
 0xa2a   : > { %1967 = vrot.lane.b32.xlu1 %v3651_v48, %s3228_s23 }
 0xa2b   : > { %1969 = vrot.lane.b32.xlu0 %v3658_v2, %s3228_s23  ;;  %s3237_s23 = smov 97  }
 0xa2e   : > { %1991 = vrot.lane.b32.xlu1 %v3651_v48, %s3229_s19 }
 0xa2f   : > { %1993 = vrot.lane.b32.xlu0 %v3658_v2, %s3229_s19  ;;  %s3238_s19 = smov 96  }
 0xa32   : > { %2015 = vrot.lane.b32.xlu1 %v3651_v48, %s3230_s27 }
 0xa33   : > { %2017 = vrot.lane.b32.xlu0 %v3658_v2, %s3230_s27  ;;  %s2807_s27 = sshll.u32 %s3365_s1, 8 }
 0xa34   : > { %s3911_s9 = scalar_lea.hbm %s4092_s8, %s2807_s27 }
 0xa36   : > { %2039 = vrot.lane.b32.xlu1 %v3651_v48, %s3231_s26 }
 0xa37   : > { %2041 = vrot.lane.b32.xlu0 %v3658_v2, %s3231_s26  ;;  %s657_s26 = scalar_lea.vmem [#allocation9], %s3490_s25 }
 0xa3a   : > { %2063 = vrot.lane.b32.xlu1 %v3651_v48, %s3232_s22 }
 0xa3b   : > { %2065 = vrot.lane.b32.xlu0 %v3658_v2, %s3232_s22  ;;  %s3239_s22 = smov 95  }
 0xa3e   : > { %2087 = vrot.lane.b32.xlu1 %v3651_v48, %s3233_s5 }
 0xa3f   : > { %2089 = vrot.lane.b32.xlu0 %v3658_v2, %s3233_s5  ;;  %s3240_s5 = smov 94  }
 0xa42   : > { %2111 = vrot.lane.b32.xlu1 %v3651_v48, %s3234_s2 }
 0xa43   : > { %2113 = vrot.lane.b32.xlu0 %v3658_v2, %s3234_s2  ;;  %s3903_s2 = scalar_lea.hbm %s4091_s7, %s2807_s27 }
 0xa46   : > { %2135 = vrot.lane.b32.xlu1 %v3651_v48, %s3235_s3 }
 0xa47   : > { %2137 = vrot.lane.b32.xlu0 %v3658_v2, %s3235_s3  ;;  %s4088_s3 = sld [smem:[#allocation22_spill]] }
 0xa4a   : > { %2159 = vrot.lane.b32.xlu1 %v3651_v48, %s3236_s29 }
 0xa4b   : > { %2161 = vrot.lane.b32.xlu0 %v3658_v2, %s3236_s29 }
 0xa4d   : > { %v1709_v57 = vld [vmem:[%s4088_s3] ss:$8 sm:$0x3]  ;;  %v2769_v60 = vld [vmem:[%s4088_s3 + $0x1] ss:$8 sm:$0x3] }
 0xa4e   : > { %2183 = vrot.lane.b32.xlu1 %v3651_v48, %s3237_s23  ;;  %v1714_v62 = vrot.slane %v1709_v57, %v3727_v56  ;;  %v1718_v63 = vrot.slane %v1709_v57, %v3732_v58  ;;  %v1738_v1 = vrot.slane %v2769_v60, %v3727_v56  ;;  %v1742_v4 = vrot.slane %v2769_v60, %v3732_v58  ;;  %v2770_v13 = vld [vmem:[%s4088_s3 + $0x2] ss:$8 sm:$0x3]  ;;  %v2771_v17 = vld [vmem:[%s4088_s3 + $0x3] ss:$8 sm:$0x3] }
 0xa4f   : > { %2185 = vrot.lane.b32.xlu0 %v3658_v2, %s3237_s23  ;;  %v1762_v21 = vrot.slane %v2770_v13, %v3727_v56  ;;  %v1766_v22 = vrot.slane %v2770_v13, %v3732_v58  ;;  %v1786_v23 = vrot.slane %v2771_v17, %v3727_v56  ;;  %v1790_v24 = vrot.slane %v2771_v17, %v3732_v58  ;;  %v2772_v25 = vld [vmem:[%s4088_s3 + $0x5] ss:$8 sm:$0x3]  ;;  %v2773_v47 = vld [vmem:[%s4088_s3 + $0x6] ss:$8 sm:$0x3] }
 0xa50   : > { %v1812_v32 = vrot.slane %v2772_v25, %v3727_v56  ;;  %v1816_v33 = vrot.slane %v2772_v25, %v3732_v58  ;;  %v1836_v53 = vrot.slane %v2773_v47, %v3727_v56  ;;  %v1840_v54 = vrot.slane %v2773_v47, %v3732_v58  ;;  %v2406_v25 = vld [vmem:[%s4089_s11] sm:$0xff]  ;;  %s4090_s23 = sld [smem:[#allocation34_spill]] }
 0xa52   : > { %2207 = vrot.lane.b32.xlu1 %v3651_v48, %s3238_s19 }
 0xa53   : > { %2209 = vrot.lane.b32.xlu0 %v3658_v2, %s3238_s19  ;;  %s2532_s19 = sand.u32 1, %s3365_s1   ;;  %s3241_s1 = smov [#allocation9]  }
 0xa54   : > { %s3915_s10 = scalar_lea.sflag [#allocation10], %s2532_s19 }
 0xa56   : > { %2231 = vrot.lane.b32.xlu1 %v3651_v48, %s3239_s22 }
 0xa57   : > { %2233 = vrot.lane.b32.xlu0 %v3658_v2, %s3239_s22  ;;  %s2566_s22 = sshll.u32 %s657_s26, 4  ;;  %s3897_s22 = int_to_ptr.vmem [resolvable:$true] %s2566_s22 }
 0xa58   : > { %s3081_s11 = scalar_lea.vmem %s3897_s22, 256 }
 0xa59   : > { %p3082_p9 = scmp.ne.s32.totalorder %s3897_s22, %s3081_s11 }
 0xa5a   : > { %2255 = vrot.lane.b32.xlu1 %v3651_v48, %s3240_s5 }
 0xa5b   : > { %2257 = vrot.lane.b32.xlu0 %v3658_v2, %s3240_s5  ;;  %s2580_s5 = sshll.u32 %s3654_s24, 4  ;;  %p3083_p12 = pnand %p3082_p9, %p3438_p8  ;;  %s3905_s5 = int_to_ptr.vmem [resolvable:$true] %s2580_s5 }
 0xa5c   : > { %s3085_s24 = sshll.u32 %s3241_s1, 4  ;;  %s3086_s24 = int_to_ptr.vmem [resolvable:$false] %s3085_s24 }
 0xa5d   : > { %p3084_p13 = pneg %p3083_p12  ;;  %s3087_s12 = scalar_lea.vmem %s3086_s24, 512 }
 0xa5e   : > { %2484 = vperm.xlu1 %3022, %v2481_v49   ;;  %v2774_v49 = vld [vmem:[%s4088_s3 + $0x7] ss:$8 sm:$0x3]  ;;  %p3088_p0 = scmp.lt.s32.totalorder %s3897_s22, %s3086_s24  ;;  %p3089_p5 = scmp.lt.s32.totalorder %s3087_s12, %s3081_s11 }
 0xa5f   : > { %2502 = vperm.xlu0 %3021, %v2499_v50   ;;  %v1860_v57 = vrot.slane %v2774_v49, %v3727_v56 }
 0xa60   : > { %p3090_p10 = por %p3089_p5, %p3088_p0 }
 0xa62   : > { %2492 = vperm.xlu1 %3022, %v2489_v51   ;;  %p3091_p1 = pnand %p3090_p10, %p3084_p13 }
 0xa63   : > { %2510 = vperm.xlu0 %3021, %v2507_v52  }
 0xa70   : > { %v1701_v59 = vpop.permute.xlu1 %1700 }
 0xa71   : > { %v1703_v61 = vpop.permute.xlu0 %1702 }
 0xa72   : > { %v1707_v5 = vsel %vm1706_vm3, %v1701_v59, %v1703_v61  ;;  %v1708_v6 = vsel %vm1706_vm3, %v1703_v61, %v1701_v59  ;;  %v1864_v59 = vrot.slane %v2774_v49, %v3732_v58  ;;  %v2779_v49 = vld [vmem:[%s4088_s3 + $0x14] ss:$8 sm:$0x3]  ;;  %vm2091_vm3 = vcmp.lt.s32.totalorder %v3725_v55, 126 }
 0xa73   : > { %v1721_v11 = vmul.f32 %v1714_v62, %v1708_v6  ;;  %v1722_v14 = vmul.f32 %v1718_v63, %v1707_v5 }
 0xa74   : > { %v1726_v7 = vpop.permute.xlu1 %1725 }
 0xa75   : > { %v1728_v8 = vpop.permute.xlu0 %1727 }
 0xa76   : > { %v1730_v9 = vsel %vm1729_vm4, %v1726_v7, %v1728_v8  ;;  %v1731_v10 = vsel %vm1729_vm4, %v1728_v8, %v1726_v7  ;;  %vm2115_vm4 = vcmp.lt.s32.totalorder %v3725_v55, 114 }
 0xa77   : > { %v1745_v12 = vmul.f32 %v1738_v1, %v1731_v10  ;;  %v1746_v15 = vmul.f32 %v1742_v4, %v1730_v9  ;;  %v2776_v9 = vld [vmem:[%s4088_s3 + $0x11] ss:$8 sm:$0x3] }
 0xa78   : > { %v1750_v16 = vpop.permute.xlu1 %1749 }
 0xa79   : > { %v2866_v18 = vpack.c.bf16 %v1745_v12, %v1721_v11  ;;  %v1752_v19 = vpop.permute.xlu0 %1751  ;;  %v2864_v20 = vpack.c.bf16 %v1746_v15, %v1722_v14 }
 0xa7a   : > { %v1754_v26 = vsel %vm1753_vm5, %v1750_v16, %v1752_v19  ;;  %v1755_v27 = vsel %vm1753_vm5, %v1752_v19, %v1750_v16  ;;  %v1908_v16 = vrot.slane %v2776_v9, %v3727_v56  ;;  %v1912_v19 = vrot.slane %v2776_v9, %v3732_v58  ;;  %v2781_v9 = vld [vmem:[%s4088_s3 + $0x16] ss:$8 sm:$0x3] }
 0xa7b   : > { %2865 = vmatprep.subr.bf16.mxu1 %v2864_v20  ;;  %2913 = vmatprep.subr.bf16.mxu0 %v2864_v20  ;;  %v1769_v34 = vmul.f32 %v1762_v21, %v1755_v27  ;;  %v1770_v35 = vmul.f32 %v1766_v22, %v1754_v26  ;;  %vm2139_vm5 = vcmp.lt.s32.totalorder %v3725_v55, 110 }
 0xa7c   : > { %v1774_v28 = vpop.permute.xlu1 %1773  ;;  %2867 = vmatpush1.bf16.msra.mxu1 %v2866_v18  ;;  %2915 = vmatpush1.bf16.msra.mxu0 %v2866_v18 }
 0xa7d   : > { %v1776_v29 = vpop.permute.xlu0 %1775 }
 0xa7e   : > { %v1778_v30 = vsel %vm1777_vm6, %v1774_v28, %v1776_v29  ;;  %v1779_v31 = vsel %vm1777_vm6, %v1776_v29, %v1774_v28  ;;  %v2777_v28 = vld [vmem:[%s4088_s3 + $0x12] ss:$8 sm:$0x3]  ;;  %vm2163_vm6 = vcmp.lt.s32.totalorder %v3725_v55, 98 }
 0xa7f   : > { %v1793_v36 = vmul.f32 %v1786_v23, %v1779_v31  ;;  %v1794_v37 = vmul.f32 %v1790_v24, %v1778_v30  ;;  %v2778_v30 = vld [vmem:[%s4088_s3 + $0x13] ss:$8 sm:$0x3] }
 0xa80   : > { %v1800_v38 = vpop.permute.xlu1 %1799 }
 0xa81   : > { %v2870_v39 = vpack.c.bf16 %v1793_v36, %v1769_v34  ;;  %v1802_v40 = vpop.permute.xlu0 %1801  ;;  %v2868_v41 = vpack.c.bf16 %v1794_v37, %v1770_v35  ;;  %v1932_v34 = vrot.slane %v2777_v28, %v3727_v56  ;;  %v1936_v35 = vrot.slane %v2777_v28, %v3732_v58 }
 0xa82   : > { %v1804_v42 = vsel %vm1803_vm7, %v1800_v38, %v1802_v40  ;;  %v1805_v43 = vsel %vm1803_vm7, %v1802_v40, %v1800_v38  ;;  %v1956_v36 = vrot.slane %v2778_v30, %v3727_v56  ;;  %v1960_v37 = vrot.slane %v2778_v30, %v3732_v58 }
 0xa83   : > { %v1819_v44 = vmul.f32 %v1812_v32, %v1804_v42  ;;  %v1820_v0 = vmul.f32 %v1816_v33, %v1805_v43  ;;  %2869 = vmatprep.subr.bf16.mxu1 %v2868_v41  ;;  %2917 = vmatprep.subr.bf16.mxu0 %v2868_v41  ;;  %vm2187_vm7 = vcmp.lt.s32.totalorder %v3725_v55, 97 }
 0xa84   : > { %v1824_v3 = vpop.permute.xlu1 %1823  ;;  %2871 = vmatpush1.bf16.msra.mxu1 %v2870_v39  ;;  %2919 = vmatpush1.bf16.msra.mxu0 %v2870_v39 }
 0xa85   : > { %v2874_v50 = vpack.c.bf16 %v1819_v44, %v3651_v48  ;;  %v1826_v51 = vpop.permute.xlu0 %1825  ;;  %v2872_v52 = vpack.c.bf16 %v1820_v0, %v3658_v2  ;;  %v2775_v48 = vld [vmem:[%s4088_s3 + $0x10] ss:$8 sm:$0x3] }
 0xa86   : > { %v1828_v60 = vsel %vm1827_vm8, %v1824_v3, %v1826_v51  ;;  %v1829_v61 = vsel %vm1827_vm8, %v1826_v51, %v1824_v3  ;;  %v1888_v4 = vrot.slane %v2775_v48, %v3732_v58  ;;  %v1884_v15 = vrot.slane %v2775_v48, %v3727_v56  ;;  %v2780_v51 = vld [vmem:[%s4088_s3 + $0x15] ss:$8 sm:$0x3] }
 0xa87   : > { %2873 = vmatprep.subr.bf16.mxu1 %v2872_v52  ;;  %2921 = vmatprep.subr.bf16.mxu0 %v2872_v52  ;;  %v1843_v5 = vmul.f32 %v1836_v53, %v1828_v60  ;;  %v1844_v6 = vmul.f32 %v1840_v54, %v1829_v61  ;;  %v2004_v48 = vrot.slane %v2780_v51, %v3727_v56  ;;  %vm2211_vm8 = vcmp.lt.s32.totalorder %v3725_v55, 96 }
 0xa88   : > { %v1848_v62 = vpop.permute.xlu1 %1847  ;;  %2875 = vmatpush1.bf16.msra.mxu1 %v2874_v50  ;;  %2923 = vmatpush1.bf16.msra.mxu0 %v2874_v50  ;;  %v2008_v60 = vrot.slane %v2780_v51, %v3732_v58 }
 0xa89   : > { %v1850_v2 = vpop.permute.xlu0 %1849 }
 0xa8a   : > { %v1852_v63 = vsel %vm1851_vm9, %v1848_v62, %v1850_v2  ;;  %v1853_v1 = vsel %vm1851_vm9, %v1850_v2, %v1848_v62  ;;  %vm2235_vm9 = vcmp.lt.s32.totalorder %v3725_v55, 95 }
 0xa8b   : > { %v1867_v7 = vmul.f32 %v1860_v57, %v1852_v63  ;;  %v1868_v8 = vmul.f32 %v1864_v59, %v1853_v1  ;;  %v1980_v57 = vrot.slane %v2779_v49, %v3727_v56  ;;  %v1984_v59 = vrot.slane %v2779_v49, %v3732_v58 }
 0xa8c   : > { %v1872_v10 = vpop.permute.xlu1 %1871 }
 0xa8d   : > { %v2878_v11 = vpack.c.bf16 %v1867_v7, %v1843_v5  ;;  %v1874_v14 = vpop.permute.xlu0 %1873  ;;  %v2876_v12 = vpack.c.bf16 %v1868_v8, %v1844_v6 }
 0xa8e   : > { %v1877_v13 = vsel %vm1875_vm10, %v1874_v14, %v1872_v10  ;;  %v1876_v17 = vsel %vm1875_vm10, %v1872_v10, %v1874_v14  ;;  %vm2259_vm10 = vcmp.lt.s32.totalorder %v3725_v55, 94 }
 0xa8f   : > { %v1892_v18 = vmul.f32 %v1888_v4, %v1877_v13  ;;  %2877 = vmatprep.subr.bf16.mxu1 %v2876_v12  ;;  %2925 = vmatprep.subr.bf16.mxu0 %v2876_v12  ;;  %v1891_v22 = vmul.f32 %v1884_v15, %v1876_v17  ;;  %v2028_v13 = vrot.slane %v2781_v9, %v3727_v56 }
 0xa90   : > { %v1896_v20 = vpop.permute.xlu1 %1895  ;;  %2879 = vmatpush1.bf16.msra.mxu1 %v2878_v11  ;;  %2927 = vmatpush1.bf16.msra.mxu0 %v2878_v11  ;;  %v2782_v11 = vld [vmem:[%s4088_s3 + $0x17] ss:$8 sm:$0x3] }
 0xa91   : > { %2426 = vmatprep.subr.mxu0 %v1892_v18  ;;  %v1898_v21 = vpop.permute.xlu0 %1897  ;;  %v2052_v17 = vrot.slane %v2782_v11, %v3727_v56 }
 0xa92   : > { %v1900_v23 = vsel %vm1899_vm11, %v1896_v20, %v1898_v21  ;;  %v1901_v24 = vsel %vm1899_vm11, %v1898_v21, %v1896_v20 }
 0xa93   : > { %v1915_v26 = vmul.f32 %v1908_v16, %v1901_v24  ;;  %v1916_v27 = vmul.f32 %v1912_v19, %v1900_v23  ;;  %v2032_v16 = vrot.slane %v2781_v9, %v3732_v58 }
 0xa94   : > { %v1920_v29 = vpop.permute.xlu1 %1919  ;;  %2427 = vmatpush1.msra.mxu0 %v1891_v22 }
 0xa95   : > { %v2882_v31 = vpack.c.bf16 %v1915_v26, %v1891_v22  ;;  %2793 = vmatmul.mubr.msk.f32.vlgmr.msra.gmra.mrb[26].mxu0 %vm2331_vm2, %v2406_v25  ;;  %v1922_v32 = vpop.permute.xlu0 %1921  ;;  %v2880_v33 = vpack.c.bf16 %v1916_v27, %v1892_v18  ;;  %v2056_v18 = vrot.slane %v2782_v11, %v3732_v58  ;;  %vm2067_vm2 = vcmp.lt.s32.totalorder %v3725_v55, 2  ;;  %v2329_v55 = vld [vmem:[%s4019_s14] sm:$0xff] }
 0xa96   : > { %v1924_v38 = vsel %vm1923_vm12, %v1920_v29, %v1922_v32  ;;  %v1925_v39 = vsel %vm1923_vm12, %v1922_v32, %v1920_v29  ;;  %v2783_v29 = vld [vmem:[%s4088_s3 + $0x20] ss:$8 sm:$0x3] }
 0xa97   : > { %2881 = vmatprep.subr.bf16.mxu1 %v2880_v33  ;;  %v1939_v44 = vmul.f32 %v1932_v34, %v1925_v39  ;;  %v1940_v0 = vmul.f32 %v1936_v35, %v1924_v38  ;;  %v2076_v35 = vrot.slane %v2783_v29, %v3727_v56 }
 0xa98   : > { %v1944_v40 = vpop.permute.xlu1 %1943  ;;  %2883 = vmatpush1.bf16.msra.mxu1 %v2882_v31  ;;  %v2784_v31 = vld [vmem:[%s4088_s3 + $0x21] ss:$8 sm:$0x3] }
 0xa99   : > { %v1946_v41 = vpop.permute.xlu0 %1945  ;;  %v2104_v38 = vrot.slane %v2784_v31, %v3732_v58 }
 0xa9a   : > { %v1948_v42 = vsel %vm1947_vm13, %v1944_v40, %v1946_v41  ;;  %v1949_v43 = vsel %vm1947_vm13, %v1946_v41, %v1944_v40 }
 0xa9b   : > { %v1963_v47 = vmul.f32 %v1956_v36, %v1949_v43  ;;  %v1964_v3 = vmul.f32 %v1960_v37, %v1948_v42  ;;  %v2080_v36 = vrot.slane %v2783_v29, %v3732_v58  ;;  %v2100_v37 = vrot.slane %v2784_v31, %v3727_v56 }
 0xa9c   : > { %v1968_v50 = vpop.permute.xlu1 %1967 }
 0xa9d   : > { %v2886_v52 = vpack.c.bf16 %v1963_v47, %v1939_v44  ;;  %v1970_v53 = vpop.permute.xlu0 %1969  ;;  %v2884_v54 = vpack.c.bf16 %v1964_v3, %v1940_v0 }
 0xa9e   : > { %v1972_v61 = vsel %vm1971_vm14, %v1968_v50, %v1970_v53  ;;  %v1973_v62 = vsel %vm1971_vm14, %v1970_v53, %v1968_v50  ;;  %v2785_v50 = vld [vmem:[%s4088_s3 + $0x22] ss:$8 sm:$0x3] }
 0xa9f   : > { %2885 = vmatprep.subr.bf16.mxu1 %v2884_v54  ;;  %v1987_v5 = vmul.f32 %v1980_v57, %v1973_v62  ;;  %v1988_v6 = vmul.f32 %v1984_v59, %v1972_v61  ;;  %v2124_v59 = vrot.slane %v2785_v50, %v3727_v56 }
 0xaa0   : > { %v1992_v2 = vpop.permute.xlu1 %1991  ;;  %2887 = vmatpush1.bf16.msra.mxu1 %v2886_v52  ;;  %v2786_v52 = vld [vmem:[%s4088_s3 + $0x23] ss:$8 sm:$0x3] }
 0xaa1   : > { %v1994_v63 = vpop.permute.xlu0 %1993  ;;  %v2152_v61 = vrot.slane %v2786_v52, %v3732_v58 }
 0xaa2   : > { %v1996_v1 = vsel %vm1995_vm15, %v1992_v2, %v1994_v63  ;;  %v1997_v4 = vsel %vm1995_vm15, %v1994_v63, %v1992_v2 }
 0xaa3   : > { %v2011_v7 = vmul.f32 %v2004_v48, %v1997_v4  ;;  %v2012_v8 = vmul.f32 %v2008_v60, %v1996_v1  ;;  %v2128_v48 = vrot.slane %v2785_v50, %v3732_v58  ;;  %v2148_v60 = vrot.slane %v2786_v52, %v3727_v56 }
 0xaa4   : > { %v2016_v10 = vpop.permute.xlu1 %2015 }
 0xaa5   : > { %v2890_v14 = vpack.c.bf16 %v2011_v7, %v1987_v5  ;;  %v2018_v12 = vpop.permute.xlu0 %2017  ;;  %v2888_v15 = vpack.c.bf16 %v2012_v8, %v1988_v6 }
 0xaa6   : > { %v2020_v19 = vsel %vm2019_vm0, %v2016_v10, %v2018_v12  ;;  %v2021_v20 = vsel %vm2019_vm0, %v2018_v12, %v2016_v10  ;;  %v2787_v10 = vld [vmem:[%s4088_s3 + $0x24] ss:$8 sm:$0x3] }
 0xaa7   : > { %2889 = vmatprep.subr.bf16.mxu1 %v2888_v15  ;;  %v2035_v25 = vmul.f32 %v2028_v13, %v2021_v20  ;;  %v2036_v26 = vmul.f32 %v2032_v16, %v2020_v19  ;;  %v2172_v16 = vrot.slane %v2787_v10, %v3727_v56 }
 0xaa8   : > { %v2040_v21 = vpop.permute.xlu1 %2039  ;;  %2891 = vmatpush1.bf16.msra.mxu1 %v2890_v14  ;;  %v2788_v14 = vld [vmem:[%s4088_s3 + $0x25] ss:$8 sm:$0x3] }
 0xaa9   : > { %v2042_v22 = vpop.permute.xlu0 %2041  ;;  %v2200_v19 = vrot.slane %v2788_v14, %v3732_v58 }
 0xaaa   : > { %v2044_v23 = vsel %vm2043_vm1, %v2040_v21, %v2042_v22  ;;  %v2045_v24 = vsel %vm2043_vm1, %v2042_v22, %v2040_v21 }
 0xaab   : > { %v2059_v27 = vmul.f32 %v2052_v17, %v2045_v24  ;;  %v2060_v28 = vmul.f32 %v2056_v18, %v2044_v23  ;;  %v2176_v17 = vrot.slane %v2787_v10, %v3732_v58  ;;  %v2196_v18 = vrot.slane %v2788_v14, %v3727_v56 }
 0xaac   : > { %v2064_v30 = vpop.permute.xlu1 %2063 }
 0xaad   : > { %v2894_v32 = vpack.c.bf16 %v2059_v27, %v2035_v25  ;;  %v2066_v33 = vpop.permute.xlu0 %2065  ;;  %v2892_v34 = vpack.c.bf16 %v2060_v28, %v2036_v26 }
 0xaae   : > { %v2068_v39 = vsel %vm2067_vm2, %v2064_v30, %v2066_v33  ;;  %v2069_v40 = vsel %vm2067_vm2, %v2066_v33, %v2064_v30  ;;  %v2789_v30 = vld [vmem:[%s4088_s3 + $0x26] ss:$8 sm:$0x3] }
 0xaaf   : > { %2893 = vmatprep.subr.bf16.mxu1 %v2892_v34  ;;  %v2083_v0 = vmul.f32 %v2076_v35, %v2069_v40  ;;  %v2084_v47 = vmul.f32 %v2080_v36, %v2068_v39  ;;  %v2220_v36 = vrot.slane %v2789_v30, %v3727_v56  ;;  %v2791_v40 = vld [vmem:[%s4088_s3 + $0x30] ss:$8 sm:$0x3] }
 0xab0   : > { %v2088_v41 = vpop.permute.xlu1 %2087  ;;  %2895 = vmatpush1.bf16.msra.mxu1 %v2894_v32  ;;  %v2790_v32 = vld [vmem:[%s4088_s3 + $0x27] ss:$8 sm:$0x3]  ;;  %s3891_s3 = scalar_lea.hbm %s4090_s23, %s2807_s27 }
 0xab1   : > { %v2090_v42 = vpop.permute.xlu0 %2089  ;;  %v2248_v39 = vrot.slane %v2790_v32, %v3732_v58 }
 0xab2   : > { %v2092_v43 = vsel %vm2091_vm3, %v2088_v41, %v2090_v42  ;;  %v2093_v44 = vsel %vm2091_vm3, %v2090_v42, %v2088_v41 }
 0xab3   : > { %v2107_v3 = vmul.f32 %v2100_v37, %v2092_v43  ;;  %v2108_v49 = vmul.f32 %v2104_v38, %v2093_v44  ;;  %v2224_v37 = vrot.slane %v2789_v30, %v3732_v58  ;;  %v2244_v38 = vrot.slane %v2790_v32, %v3727_v56 }
 0xab4   : > { %v2112_v51 = vpop.permute.xlu1 %2111 }
 0xab5   : > { %v2898_v53 = vpack.c.bf16 %v2107_v3, %v2083_v0  ;;  %v2114_v54 = vpop.permute.xlu0 %2113  ;;  %v2896_v57 = vpack.c.bf16 %v2108_v49, %v2084_v47  ;;  %v2272_v3 = vrot.slane %v2791_v40, %v3732_v58 }
 0xab6   : > { %v2116_v62 = vsel %vm2115_vm4, %v2112_v51, %v2114_v54  ;;  %v2117_v2 = vsel %vm2115_vm4, %v2114_v54, %v2112_v51 }
 0xab7   : > { %2897 = vmatprep.subr.bf16.mxu1 %v2896_v57  ;;  %v2131_v6 = vmul.f32 %v2124_v59, %v2116_v62  ;;  %v2132_v7 = vmul.f32 %v2128_v48, %v2117_v2  ;;  %v2268_v48 = vrot.slane %v2791_v40, %v3727_v56 }
 0xab8   : > { %v2136_v63 = vpop.permute.xlu1 %2135  ;;  %2899 = vmatpush1.bf16.msra.mxu1 %v2898_v53 }
 0xab9   : > { %v2138_v1 = vpop.permute.xlu0 %2137 }
 0xaba   : > { %v2140_v4 = vsel %vm2139_vm5, %v2136_v63, %v2138_v1  ;;  %v2141_v5 = vsel %vm2139_vm5, %v2138_v1, %v2136_v63 }
 0xabb   : > { %v2155_v8 = vmul.f32 %v2148_v60, %v2140_v4  ;;  %v2156_v9 = vmul.f32 %v2152_v61, %v2141_v5 }
 0xabc   : > { %v2160_v11 = vpop.permute.xlu1 %2159 }
 0xabd   : > { %v2902_v12 = vpack.c.bf16 %v2155_v8, %v2131_v6  ;;  %v2162_v15 = vpop.permute.xlu0 %2161  ;;  %v2900_v13 = vpack.c.bf16 %v2156_v9, %v2132_v7 }
 0xabe   : > { %v2164_v20 = vsel %vm2163_vm6, %v2160_v11, %v2162_v15  ;;  %v2165_v21 = vsel %vm2163_vm6, %v2162_v15, %v2160_v11 }
 0xabf   : > { %2901 = vmatprep.subr.bf16.mxu1 %v2900_v13  ;;  %v2179_v26 = vmul.f32 %v2172_v16, %v2164_v20  ;;  %v2180_v27 = vmul.f32 %v2176_v17, %v2165_v21 }
 0xac0   : > { %v2184_v22 = vpop.permute.xlu1 %2183  ;;  %2903 = vmatpush1.bf16.msra.mxu1 %v2902_v12 }
 0xac1   : > { %v2186_v23 = vpop.permute.xlu0 %2185 }
 0xac2   : > { %v2188_v24 = vsel %vm2187_vm7, %v2184_v22, %v2186_v23  ;;  %v2189_v25 = vsel %vm2187_vm7, %v2186_v23, %v2184_v22 }
 0xac3   : > { %v2203_v28 = vmul.f32 %v2196_v18, %v2188_v24  ;;  %v2204_v29 = vmul.f32 %v2200_v19, %v2189_v25 }
 0xac4   : > { %v2208_v31 = vpop.permute.xlu1 %2207 }
 0xac5   : > { %v2906_v33 = vpack.c.bf16 %v2203_v28, %v2179_v26  ;;  %v2210_v34 = vpop.permute.xlu0 %2209  ;;  %v2904_v35 = vpack.c.bf16 %v2204_v29, %v2180_v27 }
 0xac6   : > { %v2212_v41 = vsel %vm2211_vm8, %v2208_v31, %v2210_v34  ;;  %v2213_v42 = vsel %vm2211_vm8, %v2210_v34, %v2208_v31 }
 0xac7   : > { %2905 = vmatprep.subr.bf16.mxu1 %v2904_v35  ;;  %v2227_v49 = vmul.f32 %v2220_v36, %v2212_v41  ;;  %v2228_v50 = vmul.f32 %v2224_v37, %v2213_v42 }
 0xac8   : > { %v2232_v43 = vpop.permute.xlu1 %2231  ;;  %2907 = vmatpush1.bf16.msra.mxu1 %v2906_v33 }
 0xac9   : > { %v2234_v44 = vpop.permute.xlu0 %2233 }
 0xaca   : > { %v2236_v0 = vsel %vm2235_vm9, %v2232_v43, %v2234_v44  ;;  %v2237_v47 = vsel %vm2235_vm9, %v2234_v44, %v2232_v43 }
 0xacb   : > { %v2251_v51 = vmul.f32 %v2244_v38, %v2236_v0  ;;  %v2252_v52 = vmul.f32 %v2248_v39, %v2237_v47 }
 0xacc   : > { %v2256_v53 = vpop.permute.xlu1 %2255 }
 0xacd   : > { %v2910_v54 = vpack.c.bf16 %v2251_v51, %v2227_v49  ;;  %v2258_v57 = vpop.permute.xlu0 %2257  ;;  %v2908_v59 = vpack.c.bf16 %v2252_v52, %v2228_v50 }
 0xace   : > { %v2261_v60 = vsel %vm2259_vm10, %v2258_v57, %v2256_v53  ;;  %v2260_v61 = vsel %vm2259_vm10, %v2256_v53, %v2258_v57 }
 0xacf   : > { %v2276_v62 = vmul.f32 %v2272_v3, %v2261_v60  ;;  %2909 = vmatprep.subr.bf16.mxu1 %v2908_v59  ;;  %v2275_v2 = vmul.f32 %v2268_v48, %v2260_v61 }
 0xad0   : > { %2911 = vmatpush1.bf16.msra.mxu1 %v2910_v54 }
 0xad1   : > { %2383 = vmatprep.subr.mxu1 %v2276_v62 }
 0xad4   : > { %2384 = vmatpush1.msra.mxu1 %v2275_v2 }
 0xad5   : > { %2400 = vmatmul.mubr.f32.vlgmr.msra.gmra.mrb[14].mxu1 %v2329_v55 }
 0xadd   : > { %v2485_v4 = vpop.permute.xlu1 %2484 }
 0xade   : > { %v2503_v1 = vpop.permute.xlu0 %2502 }
 0xae1   : > { %v2493_v11 = vpop.permute.xlu1 %2492 }
 0xae2   : > { %v2511_v6 = vpop.permute.xlu0 %2510 }
 0xb68   : > { %v2476_v58 = vpop.f32.mrb[26].mxu0 }
 0xb69   : > { %v2478_v63 = vpop.f32.mrb[27].mxu0  ;;  %v2505_v56 = vmul.f32 %v2503_v1, %v2476_v58 }
 0xb6a   : > { %v2506_v5 = vmul.f32 %v2503_v1, %v2478_v63 }
 0xb6b   : > { %v2513_v8 = vadd.f32 %v2511_v6, %v2505_v56 }
 0xb6c   : > { %v2514_v14 = vadd.f32 %v2511_v6, %v2506_v5 }
 0xb6d   : > { %v2515_v16 = vmax.f32 %v2513_v8, 0.0 }
 0xb6e   : > { %v2516_v18 = vmax.f32 %v2514_v14, 0.0 }
 0xba8   : > { %v2401_v7 = vpop.f32.mrb[14].mxu1 }
 0xba9   : > { %v2487_v9 = vmul.f32 %v2485_v4, %v2401_v7  ;;  %v2403_v10 = vpop.f32.mrb[15].mxu1 }
 0xbaa   : > { %v2488_v12 = vmul.f32 %v2485_v4, %v2403_v10 }
 0xbab   : > { %v2495_v15 = vadd.f32 %v2493_v11, %v2487_v9 }
 0xbac   : > { %v2496_v13 = vadd.f32 %v2493_v11, %v2488_v12 }
 0xbad   : > { %v2497_v17 = vmax.f32 %v2495_v15, 0.0 }
 0xbae   : > { %v2498_v19 = vmax.f32 %v2496_v13, 0.0 }
 0xbaf   : > { %v2517_v20 = vsub.f32 %v2497_v17, %v2515_v16 }
 0xbb0   : > { %v2518_v21 = vsub.f32 %v2498_v19, %v2516_v18 }
 0xbb1   : > { %v2519_v22 = vadd.f32 %v2517_v20, %v3646_v45  ;;  %2523 = vst [vmem:[%s657_s26] sm:$0xff] %v2517_v20 }
 0xbb2   : > { %v2520_v23 = vadd.f32 %v2518_v21, %v3648_v46  ;;  %2524 = vst [vmem:[%s657_s26 + $0x8] sm:$0xff] %v2518_v21 }
 0xbb3   : > { %3094 = shalt.err (!%p3091_p1)
}
 0xbb4   : > { %s3095_s19 = scalar_lea.hbm %s3891_s3, 256  ;;  %s3099_s25 = scalar_lea.hbm %s4090_s23, 512 }
 0xbb5   : > { %p3096_p2 = scmp.ne.s32.totalorder %s3891_s3, %s3095_s19  ;;  %p3100_p11 = scmp.lt.u32.totalorder %s3891_s3, %s4090_s23 }
 0xbb6   : > { %p3101_p4 = scmp.lt.u32.totalorder %s3099_s25, %s3095_s19  ;;  %p3103_p9 = scmp.lt.u32.totalorder %s3095_s19, %s3891_s3 }
 0xbb7   : > { %p3097_p7 = pnand %p3096_p2, %p3438_p8 }
 0xbb8   : > { %p3102_p6 = por %p3101_p4, %p3100_p11 }
 0xbb9   : > { %p3098_p3 = pneg %p3097_p7 }
 0xbba   : > { %p3104_p12 = por %p3103_p9, %p3102_p6 }
 0xbbc   : > { %p3105_p13 = pnand %p3104_p12, %p3098_p3 }
 0xbbe   : > { %3108 = shalt.err (!%p3105_p13)
}
 0xbbf   : > { %2935 = dma.vmem_to_hbm [thread:$0]  (%p3438_p8), %s3897_s22, 256, %s3891_s3, %s3915_s10   ;;  %2521 = vst [vmem:[%s3894_s4] sm:$0xff] %v2519_v22  ;;  %2522 = vst [vmem:[%s3894_s4 + $0x8] sm:$0xff] %v2520_v23 }
 0xbc0   : > { %s3109_s11 = scalar_lea.vmem %s3905_s5, 256  ;;  %s3242_s12 = smov [#allocation11]  }
 0xbc1   : > { %p3110_p0 = scmp.ne.s32.totalorder %s3905_s5, %s3109_s11  ;;  %s3113_s24 = sshll.u32 %s3242_s12, 4  ;;  %s3114_s24 = int_to_ptr.vmem [resolvable:$false] %s3113_s24 }
 0xbc2   : > { %s3115_s19 = scalar_lea.vmem %s3114_s24, 512  ;;  %p3116_p1 = scmp.lt.s32.totalorder %s3905_s5, %s3114_s24 }
 0xbc3   : > { %p3111_p5 = pnand %p3110_p0, %p3438_p8  ;;  %p3117_p2 = scmp.lt.s32.totalorder %s3115_s19, %s3109_s11 }
 0xbc5   : > { %p3112_p10 = pneg %p3111_p5  ;;  %p3118_p7 = por %p3117_p2, %p3116_p1 }
 0xbc7   : > { %p3119_p3 = pnand %p3118_p7, %p3112_p10 }
 0xbc9   : > { %3122 = shalt.err (!%p3119_p3)
}
 0xbca   : > { %s3123_s4 = scalar_lea.hbm %s3903_s2, 256  ;;  %s3127_s27 = scalar_lea.hbm %s4091_s7, 512 }
 0xbcb   : > { %p3124_p11 = scmp.ne.s32.totalorder %s3903_s2, %s3123_s4  ;;  %p3128_p9 = scmp.lt.u32.totalorder %s3903_s2, %s4091_s7 }
 0xbcc   : > { %p3129_p12 = scmp.lt.u32.totalorder %s3127_s27, %s3123_s4  ;;  %p3131_p0 = scmp.lt.u32.totalorder %s3123_s4, %s3903_s2 }
 0xbcd   : > { %p3125_p4 = pnand %p3124_p11, %p3438_p8 }
 0xbce   : > { %p3130_p13 = por %p3129_p12, %p3128_p9 }
 0xbcf   : > { %p3126_p6 = pneg %p3125_p4 }
 0xbd0   : > { %p3132_p5 = por %p3131_p0, %p3130_p13 }
 0xbd2   : > { %p3133_p10 = pnand %p3132_p5, %p3126_p6 }
 0xbd4   : > { %3136 = shalt.err (!%p3133_p10)
}
 0xbd5   : > { %2936 = dma.vmem_to_hbm [thread:$0]  (%p3438_p8), %s3905_s5, 256, %s3903_s2, %s3915_s10  }
 0xbd6   : > { %s2528_s29 = scalar_lea.sflag [#allocation5], %s3487_s18  ;;  %s3137_s1 = scalar_lea.vmem %s3913_s6, 256 }
 0xbd7   : > { %p3138_p1 = scmp.ne.s32.totalorder %s3913_s6, %s3137_s1  ;;  %s3243_s11 = smov [#allocation8]  }
 0xbd8   : > { %s3141_s12 = sshll.u32 %s3243_s11, 4  ;;  %s3142_s12 = int_to_ptr.vmem [resolvable:$false] %s3141_s12 }
 0xbd9   : > { %p3139_p2 = pnand %p3138_p1, %p3438_p8  ;;  %s3143_s24 = scalar_lea.vmem %s3142_s12, 512 }
 0xbda   : > { %p3144_p3 = scmp.lt.s32.totalorder %s3913_s6, %s3142_s12  ;;  %p3145_p11 = scmp.lt.s32.totalorder %s3143_s24, %s3137_s1 }
 0xbdb   : > { %p3140_p7 = pneg %p3139_p2 }
 0xbdc   : > { %p3146_p4 = por %p3145_p11, %p3144_p3 }
 0xbde   : > { %p3147_p6 = pnand %p3146_p4, %p3140_p7 }
 0xbe0   : > { %3150 = shalt.err (!%p3147_p6)
}
 0xbe1   : > { %s3151_s10 = scalar_lea.hbm %s3911_s9, 256  ;;  %s3155_s2 = scalar_lea.hbm %s4092_s8, 512 }
 0xbe2   : > { %p3152_p9 = scmp.ne.s32.totalorder %s3911_s9, %s3151_s10  ;;  %p3156_p0 = scmp.lt.u32.totalorder %s3911_s9, %s4092_s8 }
 0xbe3   : > { %p3157_p5 = scmp.lt.u32.totalorder %s3155_s2, %s3151_s10  ;;  %p3159_p1 = scmp.lt.u32.totalorder %s3151_s10, %s3911_s9 }
 0xbe4   : > { %p3153_p12 = pnand %p3152_p9, %p3438_p8 }
 0xbe5   : > { %p3158_p10 = por %p3157_p5, %p3156_p0 }
 0xbe6   : > { %p3154_p13 = pneg %p3153_p12 }
 0xbe7   : > { %p3160_p2 = por %p3159_p1, %p3158_p10 }
 0xbe9   : > { %p3161_p7 = pnand %p3160_p2, %p3154_p13 }
 0xbeb   : > { %3164 = shalt.err (!%p3161_p7)
}
 0xbec   : > { %2934 = dma.vmem_to_hbm [thread:$0]  (%p3438_p8), %s3913_s6, 256, %s3911_s9, %s2528_s29  }
 0xbed PF: > { %s4093_s3 = sld [smem:[#allocation16_spill]]  ;;  %s4094_s22 = sld [smem:[#allocation17_spill]] }
 0xbee   : > { %p4096_p11 = scmp.ge.s32.totalorder %s3211_s21, 2 }
 0xbf3   : > { %s2592_s27 = sand.u32 1, %s4093_s3   ;;  %p4095_p3 = scmp.ne.s32.totalorder %s4094_s22, 0 }
 0xbf4   : > { %s2593_s26 = scalar_lea.sflag [#allocation5], %s2592_s27 }
 0xbf5   : > { %p2949_p4 = pnand %p4096_p11, %p4095_p3 }
 0xbf7   : > { %3190 = dma.done.wait (!%p2949_p4), %s2593_s26, 256  }
 0xbf8   : > { %3192 = vsyncadd (!%p2949_p4), %s2593_s26, 4294967040  ;;  %s4097_s25 = sadd.s32 4294967294, %s3211_s21  }
 0xbf9   : > { %s2601_s1 = sand.u32 1, %s4097_s25  }
 0xbfa   : > { %s2602_s11 = scalar_lea.sflag [#allocation10], %s2601_s1 }
 0xbfb   : > { %3194 = dma.done.wait (!%p2949_p4), %s2602_s11, 512  }
 0xbfc   : > { %3196 = vsyncadd (!%p2949_p4), %s2602_s11, 4294966784  ;;  %s4098_s21 = sld [smem:[#allocation18_spill]]  ;;  %s4099_s6 = sld [smem:[#allocation19_spill]] }
 0xbfd   : > { %s4100_s0 = smov %s3203_s30  ;;  %s4101_s30 = smov %s3207_s20 }
 0xc02   : > { %p37_p8 = scmp.ge.s32.totalorder %s4098_s21, 4   ;;  %s4102_s20 = smov %s4099_s6 }
 0xc04   :  { %39 = sbr.rel (!%p37_p8) target bundleno = 25 (0x19), region = 195 }
 0xc0b   :  { %2616 = vsyncpa [#allocation4], 1 }
 0xc0c   :  { %2618 = vsyncpa [#allocation4 + $0x1], 1 }
 0xc0d   :  { %2619 = vsyncpa [#allocation7], 1 }
 0xc0e   :  { %2620 = vsyncpa [#allocation5], 1 }
 0xc0f   :  { %2622 = vsyncpa [#allocation5 + $0x1], 1 }
 0xc10   :  { %2623 = vsyncpa [#allocation10], 1 }
 0xc11   :  { %2625 = vsyncpa [#allocation10 + $0x1], 1 }

</bundles_post_ra>
